<compile_context>
chip_gen: v6e
topology: v6e:2x2x1
jax: 0.10.0
libtpu: 0.0.40
codegen_flags: <defaults>
</compile_context>

<pallas_src>
import math

import jax
import jax.numpy as jnp
from jax.experimental import pallas as pl
from jax.experimental.pallas import tpu as pltpu

SEQUENCE = "sequence"


# ---------------------------------------------------------------------------
# Fused Pallas kernel: the full multi-layer GRU stack in a single invocation.
# Layout: time-major 2-D slab, row index = t * B + b.  Weights pre-transposed
# to (D, 3D) with PyTorch gate order [r | z | n] along the 3D axis.
# ---------------------------------------------------------------------------
def _make_gru_stack_kernel(L, B, D, n_layers):
    def kernel(x_ref, wih_ref, whh_ref, bfold_ref, bhn_ref, out_ref, gi_scr):
        # x_ref     : (L*B, D)     embedded input sequence (time-major rows)
        # wih_ref   : (N, D, 3D)   W_ih^T per layer
        # whh_ref   : (N, D, 3D)   W_hh^T per layer
        # bfold_ref : (N, 1, 3D)   b_ih + [b_hr, b_hz, 0]  (r/z biases folded)
        # bhn_ref   : (N, 1, D)    b_hn (kept separate: inside r * (...))
        # out_ref   : (L*B, D)     output block, doubles as the working buffer
        # gi_scr    : (L*B, 3D)    VMEM scratch for the bulk input projection

        # Seed the working sequence buffer (resident in VMEM) with the input.
        out_ref[...] = x_ref[...]

        for layer in range(n_layers):                       # n_iter: small, static
            wih = wih_ref[layer]                            # (D, 3D)
            whh = whh_ref[layer]                            # (D, 3D)
            bfold = bfold_ref[layer]                        # (1, 3D)
            bhn = jnp.broadcast_to(bhn_ref[layer], (B, D))  # hoisted broadcast

            # Bulk input projection for ALL timesteps: one well-shaped MXU
            # matmul, off the serial time-dependent path.
            gi_scr[...] = (
                jnp.dot(out_ref[...], wih, preferred_element_type=jnp.float32)
                + bfold)

            # Serial recurrence: one small matmul + gate math per step.
            # L is static and tiny -> fully unrolled straight-line code with
            # static slice offsets (best LLO scheduling at these shapes).
            h = jnp.zeros((B, D), jnp.float32)
            for t in range(L):
                r0 = t * B
                gi = gi_scr[r0:r0 + B, :]                               # (B, 3D)
                gh = jnp.dot(h, whh, preferred_element_type=jnp.float32)
                r = jax.nn.sigmoid(gi[:, :D] + gh[:, :D])
                z = jax.nn.sigmoid(gi[:, D:2 * D] + gh[:, D:2 * D])
                n = jnp.tanh(gi[:, 2 * D:] + r * (gh[:, 2 * D:] + bhn))
                h = (1.0 - z) * n + z * h
                # In-place overwrite is safe: this row was already consumed
                # into gi_scr; it becomes the next layer's input / final output.
                out_ref[r0:r0 + B, :] = h

    return kernel


def gru_stack_pallas(x2d, wih_all, whh_all, bfold_all, bhn_all, *, L, B, D):
    n_layers = wih_all.shape[0]
    kernel = _make_gru_stack_kernel(L, B, D, n_layers)
    return pl.pallas_call(
        kernel,
        out_shape=jax.ShapeDtypeStruct((L * B, D), jnp.float32),
        in_specs=[pl.BlockSpec(memory_space=pltpu.MemorySpace.VMEM)] * 5,
        out_specs=pl.BlockSpec(memory_space=pltpu.MemorySpace.VMEM),
        scratch_shapes=[pltpu.VMEM((L * B, 3 * D), jnp.float32)],
    )(x2d, wih_all, whh_all, bfold_all, bhn_all)


# ---------------------------------------------------------------------------
# Parameter init (mirrors RNN.reset_parameters: uniform(-stdv, stdv), biases 0;
# note reset_parameters re-initializes the embedding's padding row too, so
# row 0 is uniform-random in the PyTorch module as well).
# ---------------------------------------------------------------------------
def init_params(key, n_nodes, dim, n_layers):
    stdv = 1.0 / math.sqrt(dim)
    keys = jax.random.split(key, 1 + 2 * n_layers)
    emb = jax.random.uniform(keys[0], (n_nodes, dim), jnp.float32, -stdv, stdv)
    layers = []
    for l in range(n_layers):
        w_ih = jax.random.uniform(keys[1 + 2 * l], (3 * dim, dim), jnp.float32, -stdv, stdv)
        w_hh = jax.random.uniform(keys[2 + 2 * l], (3 * dim, dim), jnp.float32, -stdv, stdv)
        b_ih = jnp.zeros((3 * dim,), jnp.float32)
        b_hh = jnp.zeros((3 * dim,), jnp.float32)
        layers.append((w_ih, w_hh, b_ih, b_hh))
    return emb, layers


# ---------------------------------------------------------------------------
# Forward: glue in plain JAX (jitted), recurrence hot path in the fused kernel.
# ---------------------------------------------------------------------------
def rnn_forward(params, input_seq):
    emb, layers = params
    B, L = input_seq.shape
    D = emb.shape[1]

    # Embedding lookup for the single SEQUENCE key; torch.stack([h]).mean(0)
    # over one key is the identity.
    h_seq = emb[input_seq]                                          # (B, L, D)

    # Time-major 2-D slab for the kernel (row = t*B + b); fused under jit.
    x2d = jnp.transpose(h_seq, (1, 0, 2)).reshape(L * B, D)

    # Pre-transpose weights to (D, 3D) and fold biases (r/z folded, b_hn kept).
    wih_all = jnp.stack([w_ih.T for (w_ih, _, _, _) in layers])     # (N, D, 3D)
    whh_all = jnp.stack([w_hh.T for (_, w_hh, _, _) in layers])     # (N, D, 3D)
    bfold_all = jnp.stack([
        (b_ih + jnp.concatenate([b_hh[:2 * D], jnp.zeros((D,), b_hh.dtype)])
         ).reshape(1, 3 * D)
        for (_, _, b_ih, b_hh) in layers])                          # (N, 1, 3D)
    bhn_all = jnp.stack([b_hh[2 * D:].reshape(1, D)
                         for (_, _, _, b_hh) in layers])            # (N, 1, D)

    out2d = gru_stack_pallas(x2d, wih_all, whh_all, bfold_all, bhn_all,
                             L=L, B=B, D=D)

    h_local = jnp.transpose(out2d.reshape(L, B, D), (1, 0, 2))      # (B, L, D)
    # F.dropout(h_local, p, training=False) -> identity in eval mode.
    return {SEQUENCE: h_local}


# ---------------------------------------------------------------------------
# Pure-JAX reference (lax.scan GRU, PyTorch formulation) for correctness.
# ---------------------------------------------------------------------------
def _ref_gru_layer(x_tm, w_ih, w_hh, b_ih, b_hh):
    L, B, D = x_tm.shape

    def step(h, x_t):
        gi = x_t @ w_ih.T + b_ih
        gh = h @ w_hh.T + b_hh
        r = jax.nn.sigmoid(gi[:, :D] + gh[:, :D])
        z = jax.nn.sigmoid(gi[:, D:2 * D] + gh[:, D:2 * D])
        n = jnp.tanh(gi[:, 2 * D:] + r * gh[:, 2 * D:])
        h_new = (1.0 - z) * n + z * h
        return h_new, h_new

    _, ys = jax.lax.scan(step, jnp.zeros((B, D), jnp.float32), x_tm)
    return ys


def _ref_forward(params, input_seq):
    emb, layers = params
    x = jnp.transpose(emb[input_seq], (1, 0, 2))
    for (w_ih, w_hh, b_ih, b_hh) in layers:
        x = _ref_gru_layer(x, w_ih, w_hh, b_ih, b_hh)
    return jnp.transpose(x, (1, 0, 2))


if __name__ == "__main__":
    # Small config consistent with the module: batch=2, max_len=8,
    # hidden_dim=32, n_iter(=num GRU layers)=2, vocab n_nodes=50.
    B, L, D, N_LAYERS, N_NODES = 2, 8, 32, 2, 50

    key = jax.random.PRNGKey(0)
    pkey, dkey, bkey = jax.random.split(key, 3)
    params = init_params(pkey, N_NODES, D, N_LAYERS)
    # item ids in [0, N_NODES); id 0 (padding) is included — its embedding row
    # is uniform-random after reset_parameters, exactly as in the PyTorch model.
    seq = jax.random.randint(dkey, (B, L), 0, N_NODES, dtype=jnp.int32)

    fwd = jax.jit(rnn_forward)

    # Module-faithful params (zero biases).
    out = fwd(params, seq)
    h_local = jax.block_until_ready(out[SEQUENCE])
    assert h_local.shape == (B, L, D)
    ref = _ref_forward(params, seq)
    assert jnp.allclose(h_local, ref, atol=1e-5, rtol=1e-4), "mismatch (zero biases)"

    # Stress the bias path with nonzero biases (exercises folded r/z biases and
    # the b_hh_n term inside r * gh_n).
    emb, layers = params
    bkeys = jax.random.split(bkey, 2 * N_LAYERS)
    layers_b = []
    for i, (w_ih, w_hh, _, _) in enumerate(layers):
        b_ih = jax.random.uniform(bkeys[2 * i], (3 * D,), jnp.float32, -0.5, 0.5)
        b_hh = jax.random.uniform(bkeys[2 * i + 1], (3 * D,), jnp.float32, -0.5, 0.5)
        layers_b.append((w_ih, w_hh, b_ih, b_hh))
    params_b = (emb, layers_b)
    out_b = fwd(params_b, seq)
    ref_b = _ref_forward(params_b, seq)
    assert jnp.allclose(jax.block_until_ready(out_b[SEQUENCE]), ref_b,
                        atol=1e-5, rtol=1e-4), "mismatch (nonzero biases)"

    # TODO(synk): loss_function / optimizer / scheduler / compute_scores /
    # Predictor are training-time utilities outside forward(); not kernelized.
    print("KERNEL_OK")
</pallas_src>

<mosaic_0001>
module attributes {stable_mosaic.version = 11 : i64} {
  func.func @kernel(%arg0: memref<16x32xf32, #tpu.memory_space<vmem>>, %arg1: memref<2x32x96xf32, #tpu.memory_space<vmem>>, %arg2: memref<2x32x96xf32, #tpu.memory_space<vmem>>, %arg3: memref<2x1x96xf32, #tpu.memory_space<vmem>>, %arg4: memref<2x1x32xf32, #tpu.memory_space<vmem>>, %arg5: memref<16x32xf32, #tpu.memory_space<vmem>>, %arg6: memref<16x96xf32, #tpu.memory_space<vmem>>) attributes {dimension_semantics = [], scalar_prefetch = 0 : i64, scratch_operands = 1 : i64, tpu.core_type = #tpu.core_type<tc>} {
    %c0 = arith.constant 0 : index
    %c0_0 = arith.constant 0 : index
    %0 = vector.load %arg0[%c0, %c0_0] : memref<16x32xf32, #tpu.memory_space<vmem>>, vector<16x32xf32>
    %c0_1 = arith.constant 0 : index
    %c0_2 = arith.constant 0 : index
    %1 = vector.load %arg5[%c0_1, %c0_2] : memref<16x32xf32, #tpu.memory_space<vmem>>, vector<16x32xf32>
    tpu.vector_store %arg5[%c0_1, %c0_2], %0 {strides = array<i32>} : memref<16x32xf32, #tpu.memory_space<vmem>>, vector<16x32xf32>,
    %c0_3 = arith.constant 0 : index
    %c0_4 = arith.constant 0 : index
    %c0_5 = arith.constant 0 : index
    %2 = vector.load %arg1[%c0_3, %c0_4, %c0_5] : memref<2x32x96xf32, #tpu.memory_space<vmem>>, vector<1x32x96xf32>
    %3 = vector.shape_cast %2 : vector<1x32x96xf32> to vector<32x96xf32>
    %c0_6 = arith.constant 0 : index
    %c0_7 = arith.constant 0 : index
    %c0_8 = arith.constant 0 : index
    %4 = vector.load %arg2[%c0_6, %c0_7, %c0_8] : memref<2x32x96xf32, #tpu.memory_space<vmem>>, vector<1x32x96xf32>
    %5 = vector.shape_cast %4 : vector<1x32x96xf32> to vector<32x96xf32>
    %c0_9 = arith.constant 0 : index
    %c0_10 = arith.constant 0 : index
    %c0_11 = arith.constant 0 : index
    %6 = vector.load %arg3[%c0_9, %c0_10, %c0_11] : memref<2x1x96xf32, #tpu.memory_space<vmem>>, vector<1x1x96xf32>
    %7 = vector.shape_cast %6 : vector<1x1x96xf32> to vector<1x96xf32>
    %c0_12 = arith.constant 0 : index
    %c0_13 = arith.constant 0 : index
    %c0_14 = arith.constant 0 : index
    %8 = vector.load %arg4[%c0_12, %c0_13, %c0_14] : memref<2x1x32xf32, #tpu.memory_space<vmem>>, vector<1x1x32xf32>
    %9 = vector.shape_cast %8 : vector<1x1x32xf32> to vector<1x32xf32>
    %10 = vector.shape_cast %9 : vector<1x32xf32> to vector<1x32xf32>
    %11 = vector.broadcast %10 : vector<1x32xf32> to vector<2x32xf32>
    %c0_15 = arith.constant 0 : index
    %c0_16 = arith.constant 0 : index
    %12 = vector.load %arg5[%c0_15, %c0_16] : memref<16x32xf32, #tpu.memory_space<vmem>>, vector<16x32xf32>
    %cst = arith.constant dense<0.000000e+00> : vector<16x96xf32>
    %13 = tpu.matmul %12, %3, %cst {dimension_numbers = #tpu.dot_dimension_numbers<[1], [0], [0], [1], [0, 0, 1, 1], [], []>} : vector<16x32xf32>, vector<32x96xf32>, vector<16x96xf32> -> vector<16x96xf32>
    %14 = vector.broadcast %7 : vector<1x96xf32> to vector<16x96xf32>
    %15 = arith.addf %13, %14 : vector<16x96xf32>
    %c0_17 = arith.constant 0 : index
    %c0_18 = arith.constant 0 : index
    %16 = vector.load %arg6[%c0_17, %c0_18] : memref<16x96xf32, #tpu.memory_space<vmem>>, vector<16x96xf32>
    tpu.vector_store %arg6[%c0_17, %c0_18], %15 {strides = array<i32>} : memref<16x96xf32, #tpu.memory_space<vmem>>, vector<16x96xf32>,
    %cst_19 = arith.constant 0.000000e+00 : f32
    %17 = vector.broadcast %cst_19 : f32 to vector<2x32xf32>
    %c0_20 = arith.constant 0 : index
    %c0_21 = arith.constant 0 : index
    %18 = vector.load %arg6[%c0_20, %c0_21] : memref<16x96xf32, #tpu.memory_space<vmem>>, vector<2x96xf32>
    %cst_22 = arith.constant dense<0.000000e+00> : vector<2x96xf32>
    %19 = tpu.matmul %17, %5, %cst_22 {dimension_numbers = #tpu.dot_dimension_numbers<[1], [0], [0], [1], [0, 0, 1, 1], [], []>} : vector<2x32xf32>, vector<32x96xf32>, vector<2x96xf32> -> vector<2x96xf32>
    %20 = vector.extract_strided_slice %18 {offsets = [0, 0], sizes = [2, 32], strides = [1, 1]} : vector<2x96xf32> to vector<2x32xf32>
    %21 = vector.extract_strided_slice %19 {offsets = [0, 0], sizes = [2, 32], strides = [1, 1]} : vector<2x96xf32> to vector<2x32xf32>
    %22 = arith.addf %20, %21 : vector<2x32xf32>
    %23 = arith.negf %22 : vector<2x32xf32>
    %24 = math.exp %23 : vector<2x32xf32>
    %cst_23 = arith.constant 1.000000e+00 : f32
    %25 = vector.broadcast %cst_23 : f32 to vector<2x32xf32>
    %26 = arith.addf %25, %24 : vector<2x32xf32>
    %27 = arith.divf %25, %26 : vector<2x32xf32>
    %28 = vector.extract_strided_slice %18 {offsets = [0, 32], sizes = [2, 32], strides = [1, 1]} : vector<2x96xf32> to vector<2x32xf32>
    %29 = vector.extract_strided_slice %19 {offsets = [0, 32], sizes = [2, 32], strides = [1, 1]} : vector<2x96xf32> to vector<2x32xf32>
    %30 = arith.addf %28, %29 : vector<2x32xf32>
    %31 = arith.negf %30 : vector<2x32xf32>
    %32 = math.exp %31 : vector<2x32xf32>
    %cst_24 = arith.constant 1.000000e+00 : f32
    %33 = vector.broadcast %cst_24 : f32 to vector<2x32xf32>
    %34 = arith.addf %33, %32 : vector<2x32xf32>
    %35 = arith.divf %33, %34 : vector<2x32xf32>
    %36 = vector.extract_strided_slice %18 {offsets = [0, 64], sizes = [2, 32], strides = [1, 1]} : vector<2x96xf32> to vector<2x32xf32>
    %37 = vector.extract_strided_slice %19 {offsets = [0, 64], sizes = [2, 32], strides = [1, 1]} : vector<2x96xf32> to vector<2x32xf32>
    %38 = arith.addf %37, %11 : vector<2x32xf32>
    %39 = arith.mulf %27, %38 : vector<2x32xf32>
    %40 = arith.addf %36, %39 : vector<2x32xf32>
    %41 = math.tanh %40 : vector<2x32xf32>
    %cst_25 = arith.constant 1.000000e+00 : f32
    %42 = vector.broadcast %cst_25 : f32 to vector<2x32xf32>
    %43 = arith.subf %42, %35 : vector<2x32xf32>
    %44 = arith.mulf %43, %41 : vector<2x32xf32>
    %45 = arith.mulf %35, %17 : vector<2x32xf32>
    %46 = arith.addf %44, %45 : vector<2x32xf32>
    %c0_26 = arith.constant 0 : index
    %c0_27 = arith.constant 0 : index
    %47 = vector.load %arg5[%c0_26, %c0_27] : memref<16x32xf32, #tpu.memory_space<vmem>>, vector<2x32xf32>
    tpu.vector_store %arg5[%c0_26, %c0_27], %46 {strides = array<i32>} : memref<16x32xf32, #tpu.memory_space<vmem>>, vector<2x32xf32>,
    %c2 = arith.constant 2 : index
    %c0_28 = arith.constant 0 : index
    %48 = vector.load %arg6[%c2, %c0_28] : memref<16x96xf32, #tpu.memory_space<vmem>>, vector<2x96xf32>
    %cst_29 = arith.constant dense<0.000000e+00> : vector<2x96xf32>
    %49 = tpu.matmul %46, %5, %cst_29 {dimension_numbers = #tpu.dot_dimension_numbers<[1], [0], [0], [1], [0, 0, 1, 1], [], []>} : vector<2x32xf32>, vector<32x96xf32>, vector<2x96xf32> -> vector<2x96xf32>
    %50 = vector.extract_strided_slice %48 {offsets = [0, 0], sizes = [2, 32], strides = [1, 1]} : vector<2x96xf32> to vector<2x32xf32>
    %51 = vector.extract_strided_slice %49 {offsets = [0, 0], sizes = [2, 32], strides = [1, 1]} : vector<2x96xf32> to vector<2x32xf32>
    %52 = arith.addf %50, %51 : vector<2x32xf32>
    %53 = arith.negf %52 : vector<2x32xf32>
    %54 = math.exp %53 : vector<2x32xf32>
    %cst_30 = arith.constant 1.000000e+00 : f32
    %55 = vector.broadcast %cst_30 : f32 to vector<2x32xf32>
    %56 = arith.addf %55, %54 : vector<2x32xf32>
    %57 = arith.divf %55, %56 : vector<2x32xf32>
    %58 = vector.extract_strided_slice %48 {offsets = [0, 32], sizes = [2, 32], strides = [1, 1]} : vector<2x96xf32> to vector<2x32xf32>
    %59 = vector.extract_strided_slice %49 {offsets = [0, 32], sizes = [2, 32], strides = [1, 1]} : vector<2x96xf32> to vector<2x32xf32>
    %60 = arith.addf %58, %59 : vector<2x32xf32>
    %61 = arith.negf %60 : vector<2x32xf32>
    %62 = math.exp %61 : vector<2x32xf32>
    %cst_31 = arith.constant 1.000000e+00 : f32
    %63 = vector.broadcast %cst_31 : f32 to vector<2x32xf32>
    %64 = arith.addf %63, %62 : vector<2x32xf32>
    %65 = arith.divf %63, %64 : vector<2x32xf32>
    %66 = vector.extract_strided_slice %48 {offsets = [0, 64], sizes = [2, 32], strides = [1, 1]} : vector<2x96xf32> to vector<2x32xf32>
    %67 = vector.extract_strided_slice %49 {offsets = [0, 64], sizes = [2, 32], strides = [1, 1]} : vector<2x96xf32> to vector<2x32xf32>
    %68 = arith.addf %67, %11 : vector<2x32xf32>
    %69 = arith.mulf %57, %68 : vector<2x32xf32>
    %70 = arith.addf %66, %69 : vector<2x32xf32>
    %71 = math.tanh %70 : vector<2x32xf32>
    %cst_32 = arith.constant 1.000000e+00 : f32
    %72 = vector.broadcast %cst_32 : f32 to vector<2x32xf32>
    %73 = arith.subf %72, %65 : vector<2x32xf32>
    %74 = arith.mulf %73, %71 : vector<2x32xf32>
    %75 = arith.mulf %65, %46 : vector<2x32xf32>
    %76 = arith.addf %74, %75 : vector<2x32xf32>
    %c2_33 = arith.constant 2 : index
    %c0_34 = arith.constant 0 : index
    %77 = vector.load %arg5[%c2_33, %c0_34] : memref<16x32xf32, #tpu.memory_space<vmem>>, vector<2x32xf32>
    tpu.vector_store %arg5[%c2_33, %c0_34], %76 {strides = array<i32>} : memref<16x32xf32, #tpu.memory_space<vmem>>, vector<2x32xf32>,
    %c4 = arith.constant 4 : index
    %c0_35 = arith.constant 0 : index
    %78 = vector.load %arg6[%c4, %c0_35] : memref<16x96xf32, #tpu.memory_space<vmem>>, vector<2x96xf32>
    %cst_36 = arith.constant dense<0.000000e+00> : vector<2x96xf32>
    %79 = tpu.matmul %76, %5, %cst_36 {dimension_numbers = #tpu.dot_dimension_numbers<[1], [0], [0], [1], [0, 0, 1, 1], [], []>} : vector<2x32xf32>, vector<32x96xf32>, vector<2x96xf32> -> vector<2x96xf32>
    %80 = vector.extract_strided_slice %78 {offsets = [0, 0], sizes = [2, 32], strides = [1, 1]} : vector<2x96xf32> to vector<2x32xf32>
    %81 = vector.extract_strided_slice %79 {offsets = [0, 0], sizes = [2, 32], strides = [1, 1]} : vector<2x96xf32> to vector<2x32xf32>
    %82 = arith.addf %80, %81 : vector<2x32xf32>
    %83 = arith.negf %82 : vector<2x32xf32>
    %84 = math.exp %83 : vector<2x32xf32>
    %cst_37 = arith.constant 1.000000e+00 : f32
    %85 = vector.broadcast %cst_37 : f32 to vector<2x32xf32>
    %86 = arith.addf %85, %84 : vector<2x32xf32>
    %87 = arith.divf %85, %86 : vector<2x32xf32>
    %88 = vector.extract_strided_slice %78 {offsets = [0, 32], sizes = [2, 32], strides = [1, 1]} : vector<2x96xf32> to vector<2x32xf32>
    %89 = vector.extract_strided_slice %79 {offsets = [0, 32], sizes = [2, 32], strides = [1, 1]} : vector<2x96xf32> to vector<2x32xf32>
    %90 = arith.addf %88, %89 : vector<2x32xf32>
    %91 = arith.negf %90 : vector<2x32xf32>
    %92 = math.exp %91 : vector<2x32xf32>
    %cst_38 = arith.constant 1.000000e+00 : f32
    %93 = vector.broadcast %cst_38 : f32 to vector<2x32xf32>
    %94 = arith.addf %93, %92 : vector<2x32xf32>
    %95 = arith.divf %93, %94 : vector<2x32xf32>
    %96 = vector.extract_strided_slice %78 {offsets = [0, 64], sizes = [2, 32], strides = [1, 1]} : vector<2x96xf32> to vector<2x32xf32>
    %97 = vector.extract_strided_slice %79 {offsets = [0, 64], sizes = [2, 32], strides = [1, 1]} : vector<2x96xf32> to vector<2x32xf32>
    %98 = arith.addf %97, %11 : vector<2x32xf32>
    %99 = arith.mulf %87, %98 : vector<2x32xf32>
    %100 = arith.addf %96, %99 : vector<2x32xf32>
    %101 = math.tanh %100 : vector<2x32xf32>
    %cst_39 = arith.constant 1.000000e+00 : f32
    %102 = vector.broadcast %cst_39 : f32 to vector<2x32xf32>
    %103 = arith.subf %102, %95 : vector<2x32xf32>
    %104 = arith.mulf %103, %101 : vector<2x32xf32>
    %105 = arith.mulf %95, %76 : vector<2x32xf32>
    %106 = arith.addf %104, %105 : vector<2x32xf32>
    %c4_40 = arith.constant 4 : index
    %c0_41 = arith.constant 0 : index
    %107 = vector.load %arg5[%c4_40, %c0_41] : memref<16x32xf32, #tpu.memory_space<vmem>>, vector<2x32xf32>
    tpu.vector_store %arg5[%c4_40, %c0_41], %106 {strides = array<i32>} : memref<16x32xf32, #tpu.memory_space<vmem>>, vector<2x32xf32>,
    %c6 = arith.constant 6 : index
    %c0_42 = arith.constant 0 : index
    %108 = vector.load %arg6[%c6, %c0_42] : memref<16x96xf32, #tpu.memory_space<vmem>>, vector<2x96xf32>
    %cst_43 = arith.constant dense<0.000000e+00> : vector<2x96xf32>
    %109 = tpu.matmul %106, %5, %cst_43 {dimension_numbers = #tpu.dot_dimension_numbers<[1], [0], [0], [1], [0, 0, 1, 1], [], []>} : vector<2x32xf32>, vector<32x96xf32>, vector<2x96xf32> -> vector<2x96xf32>
    %110 = vector.extract_strided_slice %108 {offsets = [0, 0], sizes = [2, 32], strides = [1, 1]} : vector<2x96xf32> to vector<2x32xf32>
    %111 = vector.extract_strided_slice %109 {offsets = [0, 0], sizes = [2, 32], strides = [1, 1]} : vector<2x96xf32> to vector<2x32xf32>
    %112 = arith.addf %110, %111 : vector<2x32xf32>
    %113 = arith.negf %112 : vector<2x32xf32>
    %114 = math.exp %113 : vector<2x32xf32>
    %cst_44 = arith.constant 1.000000e+00 : f32
    %115 = vector.broadcast %cst_44 : f32 to vector<2x32xf32>
    %116 = arith.addf %115, %114 : vector<2x32xf32>
    %117 = arith.divf %115, %116 : vector<2x32xf32>
    %118 = vector.extract_strided_slice %108 {offsets = [0, 32], sizes = [2, 32], strides = [1, 1]} : vector<2x96xf32> to vector<2x32xf32>
    %119 = vector.extract_strided_slice %109 {offsets = [0, 32], sizes = [2, 32], strides = [1, 1]} : vector<2x96xf32> to vector<2x32xf32>
    %120 = arith.addf %118, %119 : vector<2x32xf32>
    %121 = arith.negf %120 : vector<2x32xf32>
    %122 = math.exp %121 : vector<2x32xf32>
    %cst_45 = arith.constant 1.000000e+00 : f32
    %123 = vector.broadcast %cst_45 : f32 to vector<2x32xf32>
    %124 = arith.addf %123, %122 : vector<2x32xf32>
    %125 = arith.divf %123, %124 : vector<2x32xf32>
    %126 = vector.extract_strided_slice %108 {offsets = [0, 64], sizes = [2, 32], strides = [1, 1]} : vector<2x96xf32> to vector<2x32xf32>
    %127 = vector.extract_strided_slice %109 {offsets = [0, 64], sizes = [2, 32], strides = [1, 1]} : vector<2x96xf32> to vector<2x32xf32>
    %128 = arith.addf %127, %11 : vector<2x32xf32>
    %129 = arith.mulf %117, %128 : vector<2x32xf32>
    %130 = arith.addf %126, %129 : vector<2x32xf32>
    %131 = math.tanh %130 : vector<2x32xf32>
    %cst_46 = arith.constant 1.000000e+00 : f32
    %132 = vector.broadcast %cst_46 : f32 to vector<2x32xf32>
    %133 = arith.subf %132, %125 : vector<2x32xf32>
    %134 = arith.mulf %133, %131 : vector<2x32xf32>
    %135 = arith.mulf %125, %106 : vector<2x32xf32>
    %136 = arith.addf %134, %135 : vector<2x32xf32>
    %c6_47 = arith.constant 6 : index
    %c0_48 = arith.constant 0 : index
    %137 = vector.load %arg5[%c6_47, %c0_48] : memref<16x32xf32, #tpu.memory_space<vmem>>, vector<2x32xf32>
    tpu.vector_store %arg5[%c6_47, %c0_48], %136 {strides = array<i32>} : memref<16x32xf32, #tpu.memory_space<vmem>>, vector<2x32xf32>,
    %c8 = arith.constant 8 : index
    %c0_49 = arith.constant 0 : index
    %138 = vector.load %arg6[%c8, %c0_49] : memref<16x96xf32, #tpu.memory_space<vmem>>, vector<2x96xf32>
    %cst_50 = arith.constant dense<0.000000e+00> : vector<2x96xf32>
    %139 = tpu.matmul %136, %5, %cst_50 {dimension_numbers = #tpu.dot_dimension_numbers<[1], [0], [0], [1], [0, 0, 1, 1], [], []>} : vector<2x32xf32>, vector<32x96xf32>, vector<2x96xf32> -> vector<2x96xf32>
    %140 = vector.extract_strided_slice %138 {offsets = [0, 0], sizes = [2, 32], strides = [1, 1]} : vector<2x96xf32> to vector<2x32xf32>
    %141 = vector.extract_strided_slice %139 {offsets = [0, 0], sizes = [2, 32], strides = [1, 1]} : vector<2x96xf32> to vector<2x32xf32>
    %142 = arith.addf %140, %141 : vector<2x32xf32>
    %143 = arith.negf %142 : vector<2x32xf32>
    %144 = math.exp %143 : vector<2x32xf32>
    %cst_51 = arith.constant 1.000000e+00 : f32
    %145 = vector.broadcast %cst_51 : f32 to vector<2x32xf32>
    %146 = arith.addf %145, %144 : vector<2x32xf32>
    %147 = arith.divf %145, %146 : vector<2x32xf32>
    %148 = vector.extract_strided_slice %138 {offsets = [0, 32], sizes = [2, 32], strides = [1, 1]} : vector<2x96xf32> to vector<2x32xf32>
    %149 = vector.extract_strided_slice %139 {offsets = [0, 32], sizes = [2, 32], strides = [1, 1]} : vector<2x96xf32> to vector<2x32xf32>
    %150 = arith.addf %148, %149 : vector<2x32xf32>
    %151 = arith.negf %150 : vector<2x32xf32>
    %152 = math.exp %151 : vector<2x32xf32>
    %cst_52 = arith.constant 1.000000e+00 : f32
    %153 = vector.broadcast %cst_52 : f32 to vector<2x32xf32>
    %154 = arith.addf %153, %152 : vector<2x32xf32>
    %155 = arith.divf %153, %154 : vector<2x32xf32>
    %156 = vector.extract_strided_slice %138 {offsets = [0, 64], sizes = [2, 32], strides = [1, 1]} : vector<2x96xf32> to vector<2x32xf32>
    %157 = vector.extract_strided_slice %139 {offsets = [0, 64], sizes = [2, 32], strides = [1, 1]} : vector<2x96xf32> to vector<2x32xf32>
    %158 = arith.addf %157, %11 : vector<2x32xf32>
    %159 = arith.mulf %147, %158 : vector<2x32xf32>
    %160 = arith.addf %156, %159 : vector<2x32xf32>
    %161 = math.tanh %160 : vector<2x32xf32>
    %cst_53 = arith.constant 1.000000e+00 : f32
    %162 = vector.broadcast %cst_53 : f32 to vector<2x32xf32>
    %163 = arith.subf %162, %155 : vector<2x32xf32>
    %164 = arith.mulf %163, %161 : vector<2x32xf32>
    %165 = arith.mulf %155, %136 : vector<2x32xf32>
    %166 = arith.addf %164, %165 : vector<2x32xf32>
    %c8_54 = arith.constant 8 : index
    %c0_55 = arith.constant 0 : index
    %167 = vector.load %arg5[%c8_54, %c0_55] : memref<16x32xf32, #tpu.memory_space<vmem>>, vector<2x32xf32>
    tpu.vector_store %arg5[%c8_54, %c0_55], %166 {strides = array<i32>} : memref<16x32xf32, #tpu.memory_space<vmem>>, vector<2x32xf32>,
    %c10 = arith.constant 10 : index
    %c0_56 = arith.constant 0 : index
    %168 = vector.load %arg6[%c10, %c0_56] : memref<16x96xf32, #tpu.memory_space<vmem>>, vector<2x96xf32>
    %cst_57 = arith.constant dense<0.000000e+00> : vector<2x96xf32>
    %169 = tpu.matmul %166, %5, %cst_57 {dimension_numbers = #tpu.dot_dimension_numbers<[1], [0], [0], [1], [0, 0, 1, 1], [], []>} : vector<2x32xf32>, vector<32x96xf32>, vector<2x96xf32> -> vector<2x96xf32>
    %170 = vector.extract_strided_slice %168 {offsets = [0, 0], sizes = [2, 32], strides = [1, 1]} : vector<2x96xf32> to vector<2x32xf32>
    %171 = vector.extract_strided_slice %169 {offsets = [0, 0], sizes = [2, 32], strides = [1, 1]} : vector<2x96xf32> to vector<2x32xf32>
    %172 = arith.addf %170, %171 : vector<2x32xf32>
    %173 = arith.negf %172 : vector<2x32xf32>
    %174 = math.exp %173 : vector<2x32xf32>
    %cst_58 = arith.constant 1.000000e+00 : f32
    %175 = vector.broadcast %cst_58 : f32 to vector<2x32xf32>
    %176 = arith.addf %175, %174 : vector<2x32xf32>
    %177 = arith.divf %175, %176 : vector<2x32xf32>
    %178 = vector.extract_strided_slice %168 {offsets = [0, 32], sizes = [2, 32], strides = [1, 1]} : vector<2x96xf32> to vector<2x32xf32>
    %179 = vector.extract_strided_slice %169 {offsets = [0, 32], sizes = [2, 32], strides = [1, 1]} : vector<2x96xf32> to vector<2x32xf32>
    %180 = arith.addf %178, %179 : vector<2x32xf32>
    %181 = arith.negf %180 : vector<2x32xf32>
    %182 = math.exp %181 : vector<2x32xf32>
    %cst_59 = arith.constant 1.000000e+00 : f32
    %183 = vector.broadcast %cst_59 : f32 to vector<2x32xf32>
    %184 = arith.addf %183, %182 : vector<2x32xf32>
    %185 = arith.divf %183, %184 : vector<2x32xf32>
    %186 = vector.extract_strided_slice %168 {offsets = [0, 64], sizes = [2, 32], strides = [1, 1]} : vector<2x96xf32> to vector<2x32xf32>
    %187 = vector.extract_strided_slice %169 {offsets = [0, 64], sizes = [2, 32], strides = [1, 1]} : vector<2x96xf32> to vector<2x32xf32>
    %188 = arith.addf %187, %11 : vector<2x32xf32>
    %189 = arith.mulf %177, %188 : vector<2x32xf32>
    %190 = arith.addf %186, %189 : vector<2x32xf32>
    %191 = math.tanh %190 : vector<2x32xf32>
    %cst_60 = arith.constant 1.000000e+00 : f32
    %192 = vector.broadcast %cst_60 : f32 to vector<2x32xf32>
    %193 = arith.subf %192, %185 : vector<2x32xf32>
    %194 = arith.mulf %193, %191 : vector<2x32xf32>
    %195 = arith.mulf %185, %166 : vector<2x32xf32>
    %196 = arith.addf %194, %195 : vector<2x32xf32>
    %c10_61 = arith.constant 10 : index
    %c0_62 = arith.constant 0 : index
    %197 = vector.load %arg5[%c10_61, %c0_62] : memref<16x32xf32, #tpu.memory_space<vmem>>, vector<2x32xf32>
    tpu.vector_store %arg5[%c10_61, %c0_62], %196 {strides = array<i32>} : memref<16x32xf32, #tpu.memory_space<vmem>>, vector<2x32xf32>,
    %c12 = arith.constant 12 : index
    %c0_63 = arith.constant 0 : index
    %198 = vector.load %arg6[%c12, %c0_63] : memref<16x96xf32, #tpu.memory_space<vmem>>, vector<2x96xf32>
    %cst_64 = arith.constant dense<0.000000e+00> : vector<2x96xf32>
    %199 = tpu.matmul %196, %5, %cst_64 {dimension_numbers = #tpu.dot_dimension_numbers<[1], [0], [0], [1], [0, 0, 1, 1], [], []>} : vector<2x32xf32>, vector<32x96xf32>, vector<2x96xf32> -> vector<2x96xf32>
    %200 = vector.extract_strided_slice %198 {offsets = [0, 0], sizes = [2, 32], strides = [1, 1]} : vector<2x96xf32> to vector<2x32xf32>
    %201 = vector.extract_strided_slice %199 {offsets = [0, 0], sizes = [2, 32], strides = [1, 1]} : vector<2x96xf32> to vector<2x32xf32>
    %202 = arith.addf %200, %201 : vector<2x32xf32>
    %203 = arith.negf %202 : vector<2x32xf32>
    %204 = math.exp %203 : vector<2x32xf32>
    %cst_65 = arith.constant 1.000000e+00 : f32
    %205 = vector.broadcast %cst_65 : f32 to vector<2x32xf32>
    %206 = arith.addf %205, %204 : vector<2x32xf32>
    %207 = arith.divf %205, %206 : vector<2x32xf32>
    %208 = vector.extract_strided_slice %198 {offsets = [0, 32], sizes = [2, 32], strides = [1, 1]} : vector<2x96xf32> to vector<2x32xf32>
    %209 = vector.extract_strided_slice %199 {offsets = [0, 32], sizes = [2, 32], strides = [1, 1]} : vector<2x96xf32> to vector<2x32xf32>
    %210 = arith.addf %208, %209 : vector<2x32xf32>
    %211 = arith.negf %210 : vector<2x32xf32>
    %212 = math.exp %211 : vector<2x32xf32>
    %cst_66 = arith.constant 1.000000e+00 : f32
    %213 = vector.broadcast %cst_66 : f32 to vector<2x32xf32>
    %214 = arith.addf %213, %212 : vector<2x32xf32>
    %215 = arith.divf %213, %214 : vector<2x32xf32>
    %216 = vector.extract_strided_slice %198 {offsets = [0, 64], sizes = [2, 32], strides = [1, 1]} : vector<2x96xf32> to vector<2x32xf32>
    %217 = vector.extract_strided_slice %199 {offsets = [0, 64], sizes = [2, 32], strides = [1, 1]} : vector<2x96xf32> to vector<2x32xf32>
    %218 = arith.addf %217, %11 : vector<2x32xf32>
    %219 = arith.mulf %207, %218 : vector<2x32xf32>
    %220 = arith.addf %216, %219 : vector<2x32xf32>
    %221 = math.tanh %220 : vector<2x32xf32>
    %cst_67 = arith.constant 1.000000e+00 : f32
    %222 = vector.broadcast %cst_67 : f32 to vector<2x32xf32>
    %223 = arith.subf %222, %215 : vector<2x32xf32>
    %224 = arith.mulf %223, %221 : vector<2x32xf32>
    %225 = arith.mulf %215, %196 : vector<2x32xf32>
    %226 = arith.addf %224, %225 : vector<2x32xf32>
    %c12_68 = arith.constant 12 : index
    %c0_69 = arith.constant 0 : index
    %227 = vector.load %arg5[%c12_68, %c0_69] : memref<16x32xf32, #tpu.memory_space<vmem>>, vector<2x32xf32>
    tpu.vector_store %arg5[%c12_68, %c0_69], %226 {strides = array<i32>} : memref<16x32xf32, #tpu.memory_space<vmem>>, vector<2x32xf32>,
    %c14 = arith.constant 14 : index
    %c0_70 = arith.constant 0 : index
    %228 = vector.load %arg6[%c14, %c0_70] : memref<16x96xf32, #tpu.memory_space<vmem>>, vector<2x96xf32>
    %cst_71 = arith.constant dense<0.000000e+00> : vector<2x96xf32>
    %229 = tpu.matmul %226, %5, %cst_71 {dimension_numbers = #tpu.dot_dimension_numbers<[1], [0], [0], [1], [0, 0, 1, 1], [], []>} : vector<2x32xf32>, vector<32x96xf32>, vector<2x96xf32> -> vector<2x96xf32>
    %230 = vector.extract_strided_slice %228 {offsets = [0, 0], sizes = [2, 32], strides = [1, 1]} : vector<2x96xf32> to vector<2x32xf32>
    %231 = vector.extract_strided_slice %229 {offsets = [0, 0], sizes = [2, 32], strides = [1, 1]} : vector<2x96xf32> to vector<2x32xf32>
    %232 = arith.addf %230, %231 : vector<2x32xf32>
    %233 = arith.negf %232 : vector<2x32xf32>
    %234 = math.exp %233 : vector<2x32xf32>
    %cst_72 = arith.constant 1.000000e+00 : f32
    %235 = vector.broadcast %cst_72 : f32 to vector<2x32xf32>
    %236 = arith.addf %235, %234 : vector<2x32xf32>
    %237 = arith.divf %235, %236 : vector<2x32xf32>
    %238 = vector.extract_strided_slice %228 {offsets = [0, 32], sizes = [2, 32], strides = [1, 1]} : vector<2x96xf32> to vector<2x32xf32>
    %239 = vector.extract_strided_slice %229 {offsets = [0, 32], sizes = [2, 32], strides = [1, 1]} : vector<2x96xf32> to vector<2x32xf32>
    %240 = arith.addf %238, %239 : vector<2x32xf32>
    %241 = arith.negf %240 : vector<2x32xf32>
    %242 = math.exp %241 : vector<2x32xf32>
    %cst_73 = arith.constant 1.000000e+00 : f32
    %243 = vector.broadcast %cst_73 : f32 to vector<2x32xf32>
    %244 = arith.addf %243, %242 : vector<2x32xf32>
    %245 = arith.divf %243, %244 : vector<2x32xf32>
    %246 = vector.extract_strided_slice %228 {offsets = [0, 64], sizes = [2, 32], strides = [1, 1]} : vector<2x96xf32> to vector<2x32xf32>
    %247 = vector.extract_strided_slice %229 {offsets = [0, 64], sizes = [2, 32], strides = [1, 1]} : vector<2x96xf32> to vector<2x32xf32>
    %248 = arith.addf %247, %11 : vector<2x32xf32>
    %249 = arith.mulf %237, %248 : vector<2x32xf32>
    %250 = arith.addf %246, %249 : vector<2x32xf32>
    %251 = math.tanh %250 : vector<2x32xf32>
    %cst_74 = arith.constant 1.000000e+00 : f32
    %252 = vector.broadcast %cst_74 : f32 to vector<2x32xf32>
    %253 = arith.subf %252, %245 : vector<2x32xf32>
    %254 = arith.mulf %253, %251 : vector<2x32xf32>
    %255 = arith.mulf %245, %226 : vector<2x32xf32>
    %256 = arith.addf %254, %255 : vector<2x32xf32>
    %c14_75 = arith.constant 14 : index
    %c0_76 = arith.constant 0 : index
    %257 = vector.load %arg5[%c14_75, %c0_76] : memref<16x32xf32, #tpu.memory_space<vmem>>, vector<2x32xf32>
    tpu.vector_store %arg5[%c14_75, %c0_76], %256 {strides = array<i32>} : memref<16x32xf32, #tpu.memory_space<vmem>>, vector<2x32xf32>,
    %c1 = arith.constant 1 : index
    %c0_77 = arith.constant 0 : index
    %c0_78 = arith.constant 0 : index
    %258 = vector.load %arg1[%c1, %c0_77, %c0_78] : memref<2x32x96xf32, #tpu.memory_space<vmem>>, vector<1x32x96xf32>
    %259 = vector.shape_cast %258 : vector<1x32x96xf32> to vector<32x96xf32>
    %c1_79 = arith.constant 1 : index
    %c0_80 = arith.constant 0 : index
    %c0_81 = arith.constant 0 : index
    %260 = vector.load %arg2[%c1_79, %c0_80, %c0_81] : memref<2x32x96xf32, #tpu.memory_space<vmem>>, vector<1x32x96xf32>
    %261 = vector.shape_cast %260 : vector<1x32x96xf32> to vector<32x96xf32>
    %c1_82 = arith.constant 1 : index
    %c0_83 = arith.constant 0 : index
    %c0_84 = arith.constant 0 : index
    %262 = vector.load %arg3[%c1_82, %c0_83, %c0_84] : memref<2x1x96xf32, #tpu.memory_space<vmem>>, vector<1x1x96xf32>
    %263 = vector.shape_cast %262 : vector<1x1x96xf32> to vector<1x96xf32>
    %c1_85 = arith.constant 1 : index
    %c0_86 = arith.constant 0 : index
    %c0_87 = arith.constant 0 : index
    %264 = vector.load %arg4[%c1_85, %c0_86, %c0_87] : memref<2x1x32xf32, #tpu.memory_space<vmem>>, vector<1x1x32xf32>
    %265 = vector.shape_cast %264 : vector<1x1x32xf32> to vector<1x32xf32>
    %266 = vector.shape_cast %265 : vector<1x32xf32> to vector<1x32xf32>
    %267 = vector.broadcast %266 : vector<1x32xf32> to vector<2x32xf32>
    %c0_88 = arith.constant 0 : index
    %c0_89 = arith.constant 0 : index
    %268 = vector.load %arg5[%c0_88, %c0_89] : memref<16x32xf32, #tpu.memory_space<vmem>>, vector<16x32xf32>
    %cst_90 = arith.constant dense<0.000000e+00> : vector<16x96xf32>
    %269 = tpu.matmul %268, %259, %cst_90 {dimension_numbers = #tpu.dot_dimension_numbers<[1], [0], [0], [1], [0, 0, 1, 1], [], []>} : vector<16x32xf32>, vector<32x96xf32>, vector<16x96xf32> -> vector<16x96xf32>
    %270 = vector.broadcast %263 : vector<1x96xf32> to vector<16x96xf32>
    %271 = arith.addf %269, %270 : vector<16x96xf32>
    %c0_91 = arith.constant 0 : index
    %c0_92 = arith.constant 0 : index
    %272 = vector.load %arg6[%c0_91, %c0_92] : memref<16x96xf32, #tpu.memory_space<vmem>>, vector<16x96xf32>
    tpu.vector_store %arg6[%c0_91, %c0_92], %271 {strides = array<i32>} : memref<16x96xf32, #tpu.memory_space<vmem>>, vector<16x96xf32>,
    %cst_93 = arith.constant 0.000000e+00 : f32
    %273 = vector.broadcast %cst_93 : f32 to vector<2x32xf32>
    %c0_94 = arith.constant 0 : index
    %c0_95 = arith.constant 0 : index
    %274 = vector.load %arg6[%c0_94, %c0_95] : memref<16x96xf32, #tpu.memory_space<vmem>>, vector<2x96xf32>
    %cst_96 = arith.constant dense<0.000000e+00> : vector<2x96xf32>
    %275 = tpu.matmul %273, %261, %cst_96 {dimension_numbers = #tpu.dot_dimension_numbers<[1], [0], [0], [1], [0, 0, 1, 1], [], []>} : vector<2x32xf32>, vector<32x96xf32>, vector<2x96xf32> -> vector<2x96xf32>
    %276 = vector.extract_strided_slice %274 {offsets = [0, 0], sizes = [2, 32], strides = [1, 1]} : vector<2x96xf32> to vector<2x32xf32>
    %277 = vector.extract_strided_slice %275 {offsets = [0, 0], sizes = [2, 32], strides = [1, 1]} : vector<2x96xf32> to vector<2x32xf32>
    %278 = arith.addf %276, %277 : vector<2x32xf32>
    %279 = arith.negf %278 : vector<2x32xf32>
    %280 = math.exp %279 : vector<2x32xf32>
    %cst_97 = arith.constant 1.000000e+00 : f32
    %281 = vector.broadcast %cst_97 : f32 to vector<2x32xf32>
    %282 = arith.addf %281, %280 : vector<2x32xf32>
    %283 = arith.divf %281, %282 : vector<2x32xf32>
    %284 = vector.extract_strided_slice %274 {offsets = [0, 32], sizes = [2, 32], strides = [1, 1]} : vector<2x96xf32> to vector<2x32xf32>
    %285 = vector.extract_strided_slice %275 {offsets = [0, 32], sizes = [2, 32], strides = [1, 1]} : vector<2x96xf32> to vector<2x32xf32>
    %286 = arith.addf %284, %285 : vector<2x32xf32>
    %287 = arith.negf %286 : vector<2x32xf32>
    %288 = math.exp %287 : vector<2x32xf32>
    %cst_98 = arith.constant 1.000000e+00 : f32
    %289 = vector.broadcast %cst_98 : f32 to vector<2x32xf32>
    %290 = arith.addf %289, %288 : vector<2x32xf32>
    %291 = arith.divf %289, %290 : vector<2x32xf32>
    %292 = vector.extract_strided_slice %274 {offsets = [0, 64], sizes = [2, 32], strides = [1, 1]} : vector<2x96xf32> to vector<2x32xf32>
    %293 = vector.extract_strided_slice %275 {offsets = [0, 64], sizes = [2, 32], strides = [1, 1]} : vector<2x96xf32> to vector<2x32xf32>
    %294 = arith.addf %293, %267 : vector<2x32xf32>
    %295 = arith.mulf %283, %294 : vector<2x32xf32>
    %296 = arith.addf %292, %295 : vector<2x32xf32>
    %297 = math.tanh %296 : vector<2x32xf32>
    %cst_99 = arith.constant 1.000000e+00 : f32
    %298 = vector.broadcast %cst_99 : f32 to vector<2x32xf32>
    %299 = arith.subf %298, %291 : vector<2x32xf32>
    %300 = arith.mulf %299, %297 : vector<2x32xf32>
    %301 = arith.mulf %291, %273 : vector<2x32xf32>
    %302 = arith.addf %300, %301 : vector<2x32xf32>
    %c0_100 = arith.constant 0 : index
    %c0_101 = arith.constant 0 : index
    %303 = vector.load %arg5[%c0_100, %c0_101] : memref<16x32xf32, #tpu.memory_space<vmem>>, vector<2x32xf32>
    tpu.vector_store %arg5[%c0_100, %c0_101], %302 {strides = array<i32>} : memref<16x32xf32, #tpu.memory_space<vmem>>, vector<2x32xf32>,
    %c2_102 = arith.constant 2 : index
    %c0_103 = arith.constant 0 : index
    %304 = vector.load %arg6[%c2_102, %c0_103] : memref<16x96xf32, #tpu.memory_space<vmem>>, vector<2x96xf32>
    %cst_104 = arith.constant dense<0.000000e+00> : vector<2x96xf32>
    %305 = tpu.matmul %302, %261, %cst_104 {dimension_numbers = #tpu.dot_dimension_numbers<[1], [0], [0], [1], [0, 0, 1, 1], [], []>} : vector<2x32xf32>, vector<32x96xf32>, vector<2x96xf32> -> vector<2x96xf32>
    %306 = vector.extract_strided_slice %304 {offsets = [0, 0], sizes = [2, 32], strides = [1, 1]} : vector<2x96xf32> to vector<2x32xf32>
    %307 = vector.extract_strided_slice %305 {offsets = [0, 0], sizes = [2, 32], strides = [1, 1]} : vector<2x96xf32> to vector<2x32xf32>
    %308 = arith.addf %306, %307 : vector<2x32xf32>
    %309 = arith.negf %308 : vector<2x32xf32>
    %310 = math.exp %309 : vector<2x32xf32>
    %cst_105 = arith.constant 1.000000e+00 : f32
    %311 = vector.broadcast %cst_105 : f32 to vector<2x32xf32>
    %312 = arith.addf %311, %310 : vector<2x32xf32>
    %313 = arith.divf %311, %312 : vector<2x32xf32>
    %314 = vector.extract_strided_slice %304 {offsets = [0, 32], sizes = [2, 32], strides = [1, 1]} : vector<2x96xf32> to vector<2x32xf32>
    %315 = vector.extract_strided_slice %305 {offsets = [0, 32], sizes = [2, 32], strides = [1, 1]} : vector<2x96xf32> to vector<2x32xf32>
    %316 = arith.addf %314, %315 : vector<2x32xf32>
    %317 = arith.negf %316 : vector<2x32xf32>
    %318 = math.exp %317 : vector<2x32xf32>
    %cst_106 = arith.constant 1.000000e+00 : f32
    %319 = vector.broadcast %cst_106 : f32 to vector<2x32xf32>
    %320 = arith.addf %319, %318 : vector<2x32xf32>
    %321 = arith.divf %319, %320 : vector<2x32xf32>
    %322 = vector.extract_strided_slice %304 {offsets = [0, 64], sizes = [2, 32], strides = [1, 1]} : vector<2x96xf32> to vector<2x32xf32>
    %323 = vector.extract_strided_slice %305 {offsets = [0, 64], sizes = [2, 32], strides = [1, 1]} : vector<2x96xf32> to vector<2x32xf32>
    %324 = arith.addf %323, %267 : vector<2x32xf32>
    %325 = arith.mulf %313, %324 : vector<2x32xf32>
    %326 = arith.addf %322, %325 : vector<2x32xf32>
    %327 = math.tanh %326 : vector<2x32xf32>
    %cst_107 = arith.constant 1.000000e+00 : f32
    %328 = vector.broadcast %cst_107 : f32 to vector<2x32xf32>
    %329 = arith.subf %328, %321 : vector<2x32xf32>
    %330 = arith.mulf %329, %327 : vector<2x32xf32>
    %331 = arith.mulf %321, %302 : vector<2x32xf32>
    %332 = arith.addf %330, %331 : vector<2x32xf32>
    %c2_108 = arith.constant 2 : index
    %c0_109 = arith.constant 0 : index
    %333 = vector.load %arg5[%c2_108, %c0_109] : memref<16x32xf32, #tpu.memory_space<vmem>>, vector<2x32xf32>
    tpu.vector_store %arg5[%c2_108, %c0_109], %332 {strides = array<i32>} : memref<16x32xf32, #tpu.memory_space<vmem>>, vector<2x32xf32>,
    %c4_110 = arith.constant 4 : index
    %c0_111 = arith.constant 0 : index
    %334 = vector.load %arg6[%c4_110, %c0_111] : memref<16x96xf32, #tpu.memory_space<vmem>>, vector<2x96xf32>
    %cst_112 = arith.constant dense<0.000000e+00> : vector<2x96xf32>
    %335 = tpu.matmul %332, %261, %cst_112 {dimension_numbers = #tpu.dot_dimension_numbers<[1], [0], [0], [1], [0, 0, 1, 1], [], []>} : vector<2x32xf32>, vector<32x96xf32>, vector<2x96xf32> -> vector<2x96xf32>
    %336 = vector.extract_strided_slice %334 {offsets = [0, 0], sizes = [2, 32], strides = [1, 1]} : vector<2x96xf32> to vector<2x32xf32>
    %337 = vector.extract_strided_slice %335 {offsets = [0, 0], sizes = [2, 32], strides = [1, 1]} : vector<2x96xf32> to vector<2x32xf32>
    %338 = arith.addf %336, %337 : vector<2x32xf32>
    %339 = arith.negf %338 : vector<2x32xf32>
    %340 = math.exp %339 : vector<2x32xf32>
    %cst_113 = arith.constant 1.000000e+00 : f32
    %341 = vector.broadcast %cst_113 : f32 to vector<2x32xf32>
    %342 = arith.addf %341, %340 : vector<2x32xf32>
    %343 = arith.divf %341, %342 : vector<2x32xf32>
    %344 = vector.extract_strided_slice %334 {offsets = [0, 32], sizes = [2, 32], strides = [1, 1]} : vector<2x96xf32> to vector<2x32xf32>
    %345 = vector.extract_strided_slice %335 {offsets = [0, 32], sizes = [2, 32], strides = [1, 1]} : vector<2x96xf32> to vector<2x32xf32>
    %346 = arith.addf %344, %345 : vector<2x32xf32>
    %347 = arith.negf %346 : vector<2x32xf32>
    %348 = math.exp %347 : vector<2x32xf32>
    %cst_114 = arith.constant 1.000000e+00 : f32
    %349 = vector.broadcast %cst_114 : f32 to vector<2x32xf32>
    %350 = arith.addf %349, %348 : vector<2x32xf32>
    %351 = arith.divf %349, %350 : vector<2x32xf32>
    %352 = vector.extract_strided_slice %334 {offsets = [0, 64], sizes = [2, 32], strides = [1, 1]} : vector<2x96xf32> to vector<2x32xf32>
    %353 = vector.extract_strided_slice %335 {offsets = [0, 64], sizes = [2, 32], strides = [1, 1]} : vector<2x96xf32> to vector<2x32xf32>
    %354 = arith.addf %353, %267 : vector<2x32xf32>
    %355 = arith.mulf %343, %354 : vector<2x32xf32>
    %356 = arith.addf %352, %355 : vector<2x32xf32>
    %357 = math.tanh %356 : vector<2x32xf32>
    %cst_115 = arith.constant 1.000000e+00 : f32
    %358 = vector.broadcast %cst_115 : f32 to vector<2x32xf32>
    %359 = arith.subf %358, %351 : vector<2x32xf32>
    %360 = arith.mulf %359, %357 : vector<2x32xf32>
    %361 = arith.mulf %351, %332 : vector<2x32xf32>
    %362 = arith.addf %360, %361 : vector<2x32xf32>
    %c4_116 = arith.constant 4 : index
    %c0_117 = arith.constant 0 : index
    %363 = vector.load %arg5[%c4_116, %c0_117] : memref<16x32xf32, #tpu.memory_space<vmem>>, vector<2x32xf32>
    tpu.vector_store %arg5[%c4_116, %c0_117], %362 {strides = array<i32>} : memref<16x32xf32, #tpu.memory_space<vmem>>, vector<2x32xf32>,
    %c6_118 = arith.constant 6 : index
    %c0_119 = arith.constant 0 : index
    %364 = vector.load %arg6[%c6_118, %c0_119] : memref<16x96xf32, #tpu.memory_space<vmem>>, vector<2x96xf32>
    %cst_120 = arith.constant dense<0.000000e+00> : vector<2x96xf32>
    %365 = tpu.matmul %362, %261, %cst_120 {dimension_numbers = #tpu.dot_dimension_numbers<[1], [0], [0], [1], [0, 0, 1, 1], [], []>} : vector<2x32xf32>, vector<32x96xf32>, vector<2x96xf32> -> vector<2x96xf32>
    %366 = vector.extract_strided_slice %364 {offsets = [0, 0], sizes = [2, 32], strides = [1, 1]} : vector<2x96xf32> to vector<2x32xf32>
    %367 = vector.extract_strided_slice %365 {offsets = [0, 0], sizes = [2, 32], strides = [1, 1]} : vector<2x96xf32> to vector<2x32xf32>
    %368 = arith.addf %366, %367 : vector<2x32xf32>
    %369 = arith.negf %368 : vector<2x32xf32>
    %370 = math.exp %369 : vector<2x32xf32>
    %cst_121 = arith.constant 1.000000e+00 : f32
    %371 = vector.broadcast %cst_121 : f32 to vector<2x32xf32>
    %372 = arith.addf %371, %370 : vector<2x32xf32>
    %373 = arith.divf %371, %372 : vector<2x32xf32>
    %374 = vector.extract_strided_slice %364 {offsets = [0, 32], sizes = [2, 32], strides = [1, 1]} : vector<2x96xf32> to vector<2x32xf32>
    %375 = vector.extract_strided_slice %365 {offsets = [0, 32], sizes = [2, 32], strides = [1, 1]} : vector<2x96xf32> to vector<2x32xf32>
    %376 = arith.addf %374, %375 : vector<2x32xf32>
    %377 = arith.negf %376 : vector<2x32xf32>
    %378 = math.exp %377 : vector<2x32xf32>
    %cst_122 = arith.constant 1.000000e+00 : f32
    %379 = vector.broadcast %cst_122 : f32 to vector<2x32xf32>
    %380 = arith.addf %379, %378 : vector<2x32xf32>
    %381 = arith.divf %379, %380 : vector<2x32xf32>
    %382 = vector.extract_strided_slice %364 {offsets = [0, 64], sizes = [2, 32], strides = [1, 1]} : vector<2x96xf32> to vector<2x32xf32>
    %383 = vector.extract_strided_slice %365 {offsets = [0, 64], sizes = [2, 32], strides = [1, 1]} : vector<2x96xf32> to vector<2x32xf32>
    %384 = arith.addf %383, %267 : vector<2x32xf32>
    %385 = arith.mulf %373, %384 : vector<2x32xf32>
    %386 = arith.addf %382, %385 : vector<2x32xf32>
    %387 = math.tanh %386 : vector<2x32xf32>
    %cst_123 = arith.constant 1.000000e+00 : f32
    %388 = vector.broadcast %cst_123 : f32 to vector<2x32xf32>
    %389 = arith.subf %388, %381 : vector<2x32xf32>
    %390 = arith.mulf %389, %387 : vector<2x32xf32>
    %391 = arith.mulf %381, %362 : vector<2x32xf32>
    %392 = arith.addf %390, %391 : vector<2x32xf32>
    %c6_124 = arith.constant 6 : index
    %c0_125 = arith.constant 0 : index
    %393 = vector.load %arg5[%c6_124, %c0_125] : memref<16x32xf32, #tpu.memory_space<vmem>>, vector<2x32xf32>
    tpu.vector_store %arg5[%c6_124, %c0_125], %392 {strides = array<i32>} : memref<16x32xf32, #tpu.memory_space<vmem>>, vector<2x32xf32>,
    %c8_126 = arith.constant 8 : index
    %c0_127 = arith.constant 0 : index
    %394 = vector.load %arg6[%c8_126, %c0_127] : memref<16x96xf32, #tpu.memory_space<vmem>>, vector<2x96xf32>
    %cst_128 = arith.constant dense<0.000000e+00> : vector<2x96xf32>
    %395 = tpu.matmul %392, %261, %cst_128 {dimension_numbers = #tpu.dot_dimension_numbers<[1], [0], [0], [1], [0, 0, 1, 1], [], []>} : vector<2x32xf32>, vector<32x96xf32>, vector<2x96xf32> -> vector<2x96xf32>
    %396 = vector.extract_strided_slice %394 {offsets = [0, 0], sizes = [2, 32], strides = [1, 1]} : vector<2x96xf32> to vector<2x32xf32>
    %397 = vector.extract_strided_slice %395 {offsets = [0, 0], sizes = [2, 32], strides = [1, 1]} : vector<2x96xf32> to vector<2x32xf32>
    %398 = arith.addf %396, %397 : vector<2x32xf32>
    %399 = arith.negf %398 : vector<2x32xf32>
    %400 = math.exp %399 : vector<2x32xf32>
    %cst_129 = arith.constant 1.000000e+00 : f32
    %401 = vector.broadcast %cst_129 : f32 to vector<2x32xf32>
    %402 = arith.addf %401, %400 : vector<2x32xf32>
    %403 = arith.divf %401, %402 : vector<2x32xf32>
    %404 = vector.extract_strided_slice %394 {offsets = [0, 32], sizes = [2, 32], strides = [1, 1]} : vector<2x96xf32> to vector<2x32xf32>
    %405 = vector.extract_strided_slice %395 {offsets = [0, 32], sizes = [2, 32], strides = [1, 1]} : vector<2x96xf32> to vector<2x32xf32>
    %406 = arith.addf %404, %405 : vector<2x32xf32>
    %407 = arith.negf %406 : vector<2x32xf32>
    %408 = math.exp %407 : vector<2x32xf32>
    %cst_130 = arith.constant 1.000000e+00 : f32
    %409 = vector.broadcast %cst_130 : f32 to vector<2x32xf32>
    %410 = arith.addf %409, %408 : vector<2x32xf32>
    %411 = arith.divf %409, %410 : vector<2x32xf32>
    %412 = vector.extract_strided_slice %394 {offsets = [0, 64], sizes = [2, 32], strides = [1, 1]} : vector<2x96xf32> to vector<2x32xf32>
    %413 = vector.extract_strided_slice %395 {offsets = [0, 64], sizes = [2, 32], strides = [1, 1]} : vector<2x96xf32> to vector<2x32xf32>
    %414 = arith.addf %413, %267 : vector<2x32xf32>
    %415 = arith.mulf %403, %414 : vector<2x32xf32>
    %416 = arith.addf %412, %415 : vector<2x32xf32>
    %417 = math.tanh %416 : vector<2x32xf32>
    %cst_131 = arith.constant 1.000000e+00 : f32
    %418 = vector.broadcast %cst_131 : f32 to vector<2x32xf32>
    %419 = arith.subf %418, %411 : vector<2x32xf32>
    %420 = arith.mulf %419, %417 : vector<2x32xf32>
    %421 = arith.mulf %411, %392 : vector<2x32xf32>
    %422 = arith.addf %420, %421 : vector<2x32xf32>
    %c8_132 = arith.constant 8 : index
    %c0_133 = arith.constant 0 : index
    %423 = vector.load %arg5[%c8_132, %c0_133] : memref<16x32xf32, #tpu.memory_space<vmem>>, vector<2x32xf32>
    tpu.vector_store %arg5[%c8_132, %c0_133], %422 {strides = array<i32>} : memref<16x32xf32, #tpu.memory_space<vmem>>, vector<2x32xf32>,
    %c10_134 = arith.constant 10 : index
    %c0_135 = arith.constant 0 : index
    %424 = vector.load %arg6[%c10_134, %c0_135] : memref<16x96xf32, #tpu.memory_space<vmem>>, vector<2x96xf32>
    %cst_136 = arith.constant dense<0.000000e+00> : vector<2x96xf32>
    %425 = tpu.matmul %422, %261, %cst_136 {dimension_numbers = #tpu.dot_dimension_numbers<[1], [0], [0], [1], [0, 0, 1, 1], [], []>} : vector<2x32xf32>, vector<32x96xf32>, vector<2x96xf32> -> vector<2x96xf32>
    %426 = vector.extract_strided_slice %424 {offsets = [0, 0], sizes = [2, 32], strides = [1, 1]} : vector<2x96xf32> to vector<2x32xf32>
    %427 = vector.extract_strided_slice %425 {offsets = [0, 0], sizes = [2, 32], strides = [1, 1]} : vector<2x96xf32> to vector<2x32xf32>
    %428 = arith.addf %426, %427 : vector<2x32xf32>
    %429 = arith.negf %428 : vector<2x32xf32>
    %430 = math.exp %429 : vector<2x32xf32>
    %cst_137 = arith.constant 1.000000e+00 : f32
    %431 = vector.broadcast %cst_137 : f32 to vector<2x32xf32>
    %432 = arith.addf %431, %430 : vector<2x32xf32>
    %433 = arith.divf %431, %432 : vector<2x32xf32>
    %434 = vector.extract_strided_slice %424 {offsets = [0, 32], sizes = [2, 32], strides = [1, 1]} : vector<2x96xf32> to vector<2x32xf32>
    %435 = vector.extract_strided_slice %425 {offsets = [0, 32], sizes = [2, 32], strides = [1, 1]} : vector<2x96xf32> to vector<2x32xf32>
    %436 = arith.addf %434, %435 : vector<2x32xf32>
    %437 = arith.negf %436 : vector<2x32xf32>
    %438 = math.exp %437 : vector<2x32xf32>
    %cst_138 = arith.constant 1.000000e+00 : f32
    %439 = vector.broadcast %cst_138 : f32 to vector<2x32xf32>
    %440 = arith.addf %439, %438 : vector<2x32xf32>
    %441 = arith.divf %439, %440 : vector<2x32xf32>
    %442 = vector.extract_strided_slice %424 {offsets = [0, 64], sizes = [2, 32], strides = [1, 1]} : vector<2x96xf32> to vector<2x32xf32>
    %443 = vector.extract_strided_slice %425 {offsets = [0, 64], sizes = [2, 32], strides = [1, 1]} : vector<2x96xf32> to vector<2x32xf32>
    %444 = arith.addf %443, %267 : vector<2x32xf32>
    %445 = arith.mulf %433, %444 : vector<2x32xf32>
    %446 = arith.addf %442, %445 : vector<2x32xf32>
    %447 = math.tanh %446 : vector<2x32xf32>
    %cst_139 = arith.constant 1.000000e+00 : f32
    %448 = vector.broadcast %cst_139 : f32 to vector<2x32xf32>
    %449 = arith.subf %448, %441 : vector<2x32xf32>
    %450 = arith.mulf %449, %447 : vector<2x32xf32>
    %451 = arith.mulf %441, %422 : vector<2x32xf32>
    %452 = arith.addf %450, %451 : vector<2x32xf32>
    %c10_140 = arith.constant 10 : index
    %c0_141 = arith.constant 0 : index
    %453 = vector.load %arg5[%c10_140, %c0_141] : memref<16x32xf32, #tpu.memory_space<vmem>>, vector<2x32xf32>
    tpu.vector_store %arg5[%c10_140, %c0_141], %452 {strides = array<i32>} : memref<16x32xf32, #tpu.memory_space<vmem>>, vector<2x32xf32>,
    %c12_142 = arith.constant 12 : index
    %c0_143 = arith.constant 0 : index
    %454 = vector.load %arg6[%c12_142, %c0_143] : memref<16x96xf32, #tpu.memory_space<vmem>>, vector<2x96xf32>
    %cst_144 = arith.constant dense<0.000000e+00> : vector<2x96xf32>
    %455 = tpu.matmul %452, %261, %cst_144 {dimension_numbers = #tpu.dot_dimension_numbers<[1], [0], [0], [1], [0, 0, 1, 1], [], []>} : vector<2x32xf32>, vector<32x96xf32>, vector<2x96xf32> -> vector<2x96xf32>
    %456 = vector.extract_strided_slice %454 {offsets = [0, 0], sizes = [2, 32], strides = [1, 1]} : vector<2x96xf32> to vector<2x32xf32>
    %457 = vector.extract_strided_slice %455 {offsets = [0, 0], sizes = [2, 32], strides = [1, 1]} : vector<2x96xf32> to vector<2x32xf32>
    %458 = arith.addf %456, %457 : vector<2x32xf32>
    %459 = arith.negf %458 : vector<2x32xf32>
    %460 = math.exp %459 : vector<2x32xf32>
    %cst_145 = arith.constant 1.000000e+00 : f32
    %461 = vector.broadcast %cst_145 : f32 to vector<2x32xf32>
    %462 = arith.addf %461, %460 : vector<2x32xf32>
    %463 = arith.divf %461, %462 : vector<2x32xf32>
    %464 = vector.extract_strided_slice %454 {offsets = [0, 32], sizes = [2, 32], strides = [1, 1]} : vector<2x96xf32> to vector<2x32xf32>
    %465 = vector.extract_strided_slice %455 {offsets = [0, 32], sizes = [2, 32], strides = [1, 1]} : vector<2x96xf32> to vector<2x32xf32>
    %466 = arith.addf %464, %465 : vector<2x32xf32>
    %467 = arith.negf %466 : vector<2x32xf32>
    %468 = math.exp %467 : vector<2x32xf32>
    %cst_146 = arith.constant 1.000000e+00 : f32
    %469 = vector.broadcast %cst_146 : f32 to vector<2x32xf32>
    %470 = arith.addf %469, %468 : vector<2x32xf32>
    %471 = arith.divf %469, %470 : vector<2x32xf32>
    %472 = vector.extract_strided_slice %454 {offsets = [0, 64], sizes = [2, 32], strides = [1, 1]} : vector<2x96xf32> to vector<2x32xf32>
    %473 = vector.extract_strided_slice %455 {offsets = [0, 64], sizes = [2, 32], strides = [1, 1]} : vector<2x96xf32> to vector<2x32xf32>
    %474 = arith.addf %473, %267 : vector<2x32xf32>
    %475 = arith.mulf %463, %474 : vector<2x32xf32>
    %476 = arith.addf %472, %475 : vector<2x32xf32>
    %477 = math.tanh %476 : vector<2x32xf32>
    %cst_147 = arith.constant 1.000000e+00 : f32
    %478 = vector.broadcast %cst_147 : f32 to vector<2x32xf32>
    %479 = arith.subf %478, %471 : vector<2x32xf32>
    %480 = arith.mulf %479, %477 : vector<2x32xf32>
    %481 = arith.mulf %471, %452 : vector<2x32xf32>
    %482 = arith.addf %480, %481 : vector<2x32xf32>
    %c12_148 = arith.constant 12 : index
    %c0_149 = arith.constant 0 : index
    %483 = vector.load %arg5[%c12_148, %c0_149] : memref<16x32xf32, #tpu.memory_space<vmem>>, vector<2x32xf32>
    tpu.vector_store %arg5[%c12_148, %c0_149], %482 {strides = array<i32>} : memref<16x32xf32, #tpu.memory_space<vmem>>, vector<2x32xf32>,
    %c14_150 = arith.constant 14 : index
    %c0_151 = arith.constant 0 : index
    %484 = vector.load %arg6[%c14_150, %c0_151] : memref<16x96xf32, #tpu.memory_space<vmem>>, vector<2x96xf32>
    %cst_152 = arith.constant dense<0.000000e+00> : vector<2x96xf32>
    %485 = tpu.matmul %482, %261, %cst_152 {dimension_numbers = #tpu.dot_dimension_numbers<[1], [0], [0], [1], [0, 0, 1, 1], [], []>} : vector<2x32xf32>, vector<32x96xf32>, vector<2x96xf32> -> vector<2x96xf32>
    %486 = vector.extract_strided_slice %484 {offsets = [0, 0], sizes = [2, 32], strides = [1, 1]} : vector<2x96xf32> to vector<2x32xf32>
    %487 = vector.extract_strided_slice %485 {offsets = [0, 0], sizes = [2, 32], strides = [1, 1]} : vector<2x96xf32> to vector<2x32xf32>
    %488 = arith.addf %486, %487 : vector<2x32xf32>
    %489 = arith.negf %488 : vector<2x32xf32>
    %490 = math.exp %489 : vector<2x32xf32>
    %cst_153 = arith.constant 1.000000e+00 : f32
    %491 = vector.broadcast %cst_153 : f32 to vector<2x32xf32>
    %492 = arith.addf %491, %490 : vector<2x32xf32>
    %493 = arith.divf %491, %492 : vector<2x32xf32>
    %494 = vector.extract_strided_slice %484 {offsets = [0, 32], sizes = [2, 32], strides = [1, 1]} : vector<2x96xf32> to vector<2x32xf32>
    %495 = vector.extract_strided_slice %485 {offsets = [0, 32], sizes = [2, 32], strides = [1, 1]} : vector<2x96xf32> to vector<2x32xf32>
    %496 = arith.addf %494, %495 : vector<2x32xf32>
    %497 = arith.negf %496 : vector<2x32xf32>
    %498 = math.exp %497 : vector<2x32xf32>
    %cst_154 = arith.constant 1.000000e+00 : f32
    %499 = vector.broadcast %cst_154 : f32 to vector<2x32xf32>
    %500 = arith.addf %499, %498 : vector<2x32xf32>
    %501 = arith.divf %499, %500 : vector<2x32xf32>
    %502 = vector.extract_strided_slice %484 {offsets = [0, 64], sizes = [2, 32], strides = [1, 1]} : vector<2x96xf32> to vector<2x32xf32>
    %503 = vector.extract_strided_slice %485 {offsets = [0, 64], sizes = [2, 32], strides = [1, 1]} : vector<2x96xf32> to vector<2x32xf32>
    %504 = arith.addf %503, %267 : vector<2x32xf32>
    %505 = arith.mulf %493, %504 : vector<2x32xf32>
    %506 = arith.addf %502, %505 : vector<2x32xf32>
    %507 = math.tanh %506 : vector<2x32xf32>
    %cst_155 = arith.constant 1.000000e+00 : f32
    %508 = vector.broadcast %cst_155 : f32 to vector<2x32xf32>
    %509 = arith.subf %508, %501 : vector<2x32xf32>
    %510 = arith.mulf %509, %507 : vector<2x32xf32>
    %511 = arith.mulf %501, %482 : vector<2x32xf32>
    %512 = arith.addf %510, %511 : vector<2x32xf32>
    %c14_156 = arith.constant 14 : index
    %c0_157 = arith.constant 0 : index
    %513 = vector.load %arg5[%c14_156, %c0_157] : memref<16x32xf32, #tpu.memory_space<vmem>>, vector<2x32xf32>
    tpu.vector_store %arg5[%c14_156, %c0_157], %512 {strides = array<i32>} : memref<16x32xf32, #tpu.memory_space<vmem>>, vector<2x32xf32>,
    return
  }
}

</mosaic_0001>

<bundles_post_ra>
// kernel: rnn_forward.1
= control target key start
LH: loop header
LB: loop body
LE: loop exit
PB: predicated region body
PF: predicated region fallthrough
CT: control target
= control target key end

     0   :  { %v2370_v0 = vmov 0.0   ;;  %vm2371_vm0 = vmmov 0   ;;  %vm22_vm1 = vcmask 261120   ;;  %s2372_s18 = smov 64   ;;  %vm129_vm2 = vcmask 785408   ;;  %s2373_s25 = smov 96   ;;  %s2844_s2 = inlined_call_operand.vmem [shape: f32[2,32,96], index: 2, kind: input, shape index: {}]   ;;  %s2845_s1 = inlined_call_operand.vmem [shape: f32[2,32,96], index: 1, kind: input, shape index: {}]   ;;  %s2846_s0 = inlined_call_operand.vmem [shape: f32[16,32], index: 0, kind: input, shape index: {}]   ;;  %s2847_s5 = inlined_call_operand.vmem [shape: f32[16,32], index: 5, kind: output, shape index: {}]   ;;  %s2848_s4 = inlined_call_operand.vmem [shape: f32[2,1,32], index: 4, kind: input, shape index: {}]   ;;  %s2849_s3 = inlined_call_operand.vmem [shape: f32[2,1,96], index: 3, kind: input, shape index: {}]  }
   0x1   :  { %2083 = vmatprep.subr.mxu1 %v2370_v0  ;;  %v2408_v1 = vld [vmem:[%s2844_s2 + $0x18] sm:$0xff]  ;;  %v2416_v3 = vld [vmem:[%s2844_s2 + $0x10] sm:$0xff]  ;;  %2091 = vmatprep.mubr.msk.f32.mxu1 %vm2371_vm0, %v2370_v0  ;;  %v2428_v5 = vld [vmem:[%s2844_s2 + $0x8] sm:$0xff]  ;;  %vm240_vm3 = vcmask 254976  }
   0x2   :  { %v28_v2 = vld [vmem:[%s2845_s1 + $0x18] sm:$0xff]  ;;  %2084 = vmatpush3.msra.mxu1 %v2408_v1  ;;  %v27_v4 = vld [vmem:[%s2845_s1 + $0x10] sm:$0xff]  ;;  %v26_v6 = vld [vmem:[%s2845_s1 + $0x8] sm:$0xff] }
   0x3   :  { %2072 = vmatprep.subr.mxu0 %v28_v2  ;;  %2085 = vmatprep.subr.mxu1 %v2370_v0  ;;  %v20_v7 = vld [vmem:[%s2846_s0] sm:$0xff]  ;;  %v21_v8 = vld [vmem:[%s2846_s0 + $0x8] sm:$0xff] }
   0x4   :  { %2073 = vmatpush3.msra.mxu0 %v28_v2  ;;  %2086 = vmatpush3.msra.mxu1 %v2416_v3  ;;  %23 = vst.msk [vmem:[%s2847_s5] sm:$0xff] %vm22_vm1, %v20_v7  ;;  %v2448_v9 = vld [vmem:[%s2844_s2] sm:$0xff]  ;;  %24 = vst.msk [vmem:[%s2847_s5 + $0x8] sm:$0xff] %vm22_vm1, %v21_v8 }
   0x5   :  { %2074 = vmatprep.subr.mxu0 %v27_v4  ;;  %2087 = vmatprep.subr.mxu1 %v2370_v0  ;;  %v25_v10 = vld [vmem:[%s2845_s1] sm:$0xff] }
   0x6   :  { %2075 = vmatpush3.msra.mxu0 %v27_v4  ;;  %2088 = vmatpush3.msra.mxu1 %v2428_v5  ;;  %v1932_v11 = vld [vmem:[%s2848_s4] ss:$0 sm:$0xff] }
   0x7   :  { %2076 = vmatprep.subr.mxu0 %v26_v6  ;;  %2089 = vmatprep.subr.mxu1 %v2370_v0  ;;  %v1933_v19 = vld [vmem:[%s2849_s3] ss:$0 sm:$0xff] }
   0x8   :  { %2077 = vmatpush3.msra.mxu0 %v26_v6  ;;  %2090 = vmatpush3.msra.mxu1 %v2448_v9 }
   0x9   :  { %2078 = vmatprep.subr.mxu0 %v25_v10  ;;  %2092 = vmatmul.mubr.f32.vlgmr.msra.gmra.mxu1 %v2370_v0 }
   0xa   :  { %2079 = vmatpush3.msra.mxu0 %v25_v10  ;;  %213 = vrot.lane.b32.xlu0 %v1932_v11, %s2372_s18 }
   0xb   :  { %2094 = vmatprep.subr.mxu0 %v2370_v0  ;;  %v40_v12 = vld [vmem:[%s2847_s5] sm:$0xff]  ;;  %2105 = vmatprep.subr.mxu1 %v2370_v0  ;;  %v41_v13 = vld [vmem:[%s2847_s5 + $0x8] sm:$0xff] }
   0xc   :  { %2113 = vmatprep.mubr.msk.f32.mxu1 %vm2371_vm0, %v2370_v0  ;;  %2080 = vmatprep.mubr.msk.f32.mxu0 %vm22_vm1, %v40_v12 }
   0xd   :  { %2106 = vmatpush3.msra.mxu1 %v2408_v1  ;;  %2081 = vmatmul.mubr.msk.f32.vlgmr.msra.gmra.mxu0 %vm22_vm1, %v41_v13 }
   0xe   :  { %2107 = vmatprep.subr.mxu1 %v2370_v0  ;;  %2095 = vmatpush3.msra.mxu0 %v2408_v1 }
   0xf   :  { %2102 = vmatprep.mubr.msk.f32.mxu0 %vm2371_vm0, %v2370_v0  ;;  %2096 = vmatprep.subr.mxu0 %v2370_v0 }
  0x10   :  { %2108 = vmatpush3.msra.mxu1 %v2416_v3  ;;  %2097 = vmatpush3.msra.mxu0 %v2416_v3 }
  0x11   :  { %2109 = vmatprep.subr.mxu1 %v2370_v0  ;;  %2098 = vmatprep.subr.mxu0 %v2370_v0 }
  0x12   :  { %2110 = vmatpush3.msra.mxu1 %v2428_v5  ;;  %2099 = vmatpush3.msra.mxu0 %v2428_v5 }
  0x13   :  { %2111 = vmatprep.subr.mxu1 %v2370_v0  ;;  %2100 = vmatprep.subr.mxu0 %v2370_v0 }
  0x14   :  { %2112 = vmatpush3.msra.mxu1 %v2448_v9  ;;  %2101 = vmatpush3.msra.mxu0 %v2448_v9 }
  0x15   :  { %2127 = vmatprep.subr.mxu1 %v2370_v0  ;;  %2116 = vmatprep.subr.mxu0 %v2370_v0 }
  0x7c   :  { %v2495_v14 = vpop.permute.xlu0 %213 }
  0xc9   :  { %v202_v15 = vpop.f32.mrf.mxu1 }
  0xca   :  { %v216_v16 = vadd.f32 %v2495_v14, %v202_v15 }
  0xcb   :  { %v2093_v17 = vpop.f32.mrf.mxu1 }
  0xcc   :  { %218 = vrot.lane.b32.xlu0 %v216_v16, %s2372_s18 }
  0xcd   :  { %v2082_v18 = vpop.f32.mrf.mxu0 }
  0xce   :  { %v126_v20 = vadd.f32 %v2082_v18, %v1933_v19 }
  0xcf   :  { %v120_v21 = vpop.f32.mrf.mxu0 }
  0xd0   :  { %131 = vst.msk [vmem:[#allocation2 + $0x8] sm:$0xff] %vm129_vm2, %v126_v20  ;;  %v121_v22 = vadd.f32 %v1933_v19, %v120_v21 }
  0xd2   :  { %130 = vst.msk [vmem:[#allocation2] sm:$0xff] %vm129_vm2, %v121_v22 }
  0xd9   :  { %v132_v23 = vld [vmem:[#allocation2] sm:$0x3]  ;;  %v242_v43 = vld [vmem:[#allocation2 + $0x2] sm:$0x3]  ;;  %v347_v63 = vld [vmem:[#allocation2 + $0x4] sm:$0x3] }
  0xda   :  { %v206_v24 = vadd.f32 %v202_v15, %v132_v23 }
  0xdc   :  { %v1936_v25 = vmul.f32 -1.442695, %v206_v24 }
  0xde   :  { %2274 = vpow2.f32 %v1936_v25  ;;  %v452_v25 = vld [vmem:[#allocation2 + $0x6] sm:$0x3] }
  0xeb   :  { %v2275_v26 = vpop.eup %2274 }
  0xec   :  { %v210_v27 = vadd.f32 1.0, %v2275_v26 }
  0xee   :  { %2276 = vrcp.f32 %v210_v27 }
  0xfb   :  { %v2277_v28 = vpop.eup %2276 }
  0xfc   :  { %v228_v34 = vsub.f32 1.0, %v2277_v28  ;;  %v234_v36 = vmul.f32 0.0, %v2277_v28 }
 0x13e   :  { %v219_v29 = vpop.permute.xlu0 %218 }
 0x13f   :  { %v221_v30 = vmul.f32 %v2277_v28, %v219_v29 }
 0x141   :  { %223 = vrot.lane.b32.xlu1 %v221_v30, %s2372_s18 }
 0x1b3   :  { %v224_v31 = vpop.permute.xlu1 %223 }
 0x1b4   :  { %v226_v32 = vadd.f32 %v224_v31, %v132_v23 }
 0x1b6   :  { %2278 = vtanh.f32 %v226_v32 }
 0x1c3   :  { %v2279_v33 = vpop.eup %2278 }
 0x1c4   :  { %230 = vrot.lane.b32.xlu1 %v2279_v33, %s2373_s25 }
 0x236   :  { %v231_v35 = vpop.permute.xlu1 %230 }
 0x237   :  { %v233_v37 = vmul.f32 %v231_v35, %v228_v34 }
 0x239   :  { %v235_v38 = vadd.f32 %v234_v36, %v233_v37 }
 0x23b   :  { %237 = vrot.lane.b32.xlu0 %v235_v38, %s2373_s25 }
 0x2ad   :  { %v238_v39 = vpop.permute.xlu0 %237 }
 0x2ae   :  { %241 = vst.msk [vmem:[%s2847_s5] sm:$0x3] %vm240_vm3, %v238_v39  ;;  %2103 = vmatmul.mubr.msk.f32.vlgmr.msra.gmra.mxu0 %vm22_vm1, %v238_v39 }
 0x2af   :  { %2117 = vmatpush3.msra.mxu0 %v2408_v1  ;;  %2124 = vmatprep.mubr.msk.f32.mxu0 %vm2371_vm0, %v2370_v0 }
 0x2b0   :  { %2118 = vmatprep.subr.mxu0 %v2370_v0 }
 0x2b1   :  { %2119 = vmatpush3.msra.mxu0 %v2416_v3 }
 0x2b2   :  { %2120 = vmatprep.subr.mxu0 %v2370_v0 }
 0x2b3   :  { %2121 = vmatpush3.msra.mxu0 %v2428_v5 }
 0x2b4   :  { %2122 = vmatprep.subr.mxu0 %v2370_v0 }
 0x2b5   :  { %2123 = vmatpush3.msra.mxu0 %v2448_v9 }
 0x2b6   :  { %2138 = vmatprep.subr.mxu0 %v2370_v0 }
 0x36e   :  { %v311_v40 = vpop.f32.mrf.mxu0 }
 0x36f   :  { %v322_v41 = vadd.f32 %v311_v40, %v2495_v14  ;;  %v315_v44 = vadd.f32 %v311_v40, %v242_v43 }
 0x370   :  { %v2104_v42 = vpop.f32.mrf.mxu0 }
 0x371   :  { %324 = vrot.lane.b32.xlu1 %v322_v41, %s2372_s18  ;;  %v1938_v45 = vmul.f32 -1.442695, %v315_v44 }
 0x373   :  { %2280 = vpow2.f32 %v1938_v45  ;;  %v557_v45 = vld [vmem:[#allocation2 + $0x8] sm:$0x3] }
 0x380   :  { %v2281_v46 = vpop.eup %2280 }
 0x381   :  { %v319_v47 = vadd.f32 1.0, %v2281_v46 }
 0x383   :  { %2282 = vrcp.f32 %v319_v47 }
 0x390   :  { %v2283_v48 = vpop.eup %2282 }
 0x391   :  { %v334_v54 = vsub.f32 1.0, %v2283_v48  ;;  %v340_v56 = vmul.f32 %v2283_v48, %v235_v38 }
 0x3e3   :  { %v325_v49 = vpop.permute.xlu1 %324 }
 0x3e4   :  { %v327_v50 = vmul.f32 %v2283_v48, %v325_v49 }
 0x3e6   :  { %329 = vrot.lane.b32.xlu0 %v327_v50, %s2372_s18 }
 0x458   :  { %v330_v51 = vpop.permute.xlu0 %329 }
 0x459   :  { %v332_v52 = vadd.f32 %v330_v51, %v242_v43 }
 0x45b   :  { %2284 = vtanh.f32 %v332_v52 }
 0x468   :  { %v2285_v53 = vpop.eup %2284 }
 0x469   :  { %336 = vrot.lane.b32.xlu1 %v2285_v53, %s2373_s25 }
 0x4db   :  { %v337_v55 = vpop.permute.xlu1 %336 }
 0x4dc   :  { %v339_v57 = vmul.f32 %v337_v55, %v334_v54 }
 0x4de   :  { %v341_v58 = vadd.f32 %v340_v56, %v339_v57 }
 0x4e0   :  { %343 = vrot.lane.b32.xlu0 %v341_v58, %s2373_s25 }
 0x552   :  { %v344_v59 = vpop.permute.xlu0 %343 }
 0x553   :  { %346 = vst.msk [vmem:[%s2847_s5 + $0x2] sm:$0x3] %vm240_vm3, %v344_v59  ;;  %2114 = vmatmul.mubr.msk.f32.vlgmr.msra.gmra.mxu1 %vm22_vm1, %v344_v59 }
 0x554   :  { %2128 = vmatpush3.msra.mxu1 %v2408_v1  ;;  %2135 = vmatprep.mubr.msk.f32.mxu1 %vm2371_vm0, %v2370_v0 }
 0x555   :  { %2129 = vmatprep.subr.mxu1 %v2370_v0 }
 0x556   :  { %2130 = vmatpush3.msra.mxu1 %v2416_v3 }
 0x557   :  { %2131 = vmatprep.subr.mxu1 %v2370_v0 }
 0x558   :  { %2132 = vmatpush3.msra.mxu1 %v2428_v5 }
 0x559   :  { %2133 = vmatprep.subr.mxu1 %v2370_v0 }
 0x55a   :  { %2134 = vmatpush3.msra.mxu1 %v2448_v9 }
 0x55b   :  { %2149 = vmatprep.subr.mxu1 %v2370_v0 }
 0x613   :  { %v416_v60 = vpop.f32.mrf.mxu1 }
 0x614   :  { %v427_v61 = vadd.f32 %v416_v60, %v2495_v14  ;;  %v420_v2 = vadd.f32 %v416_v60, %v347_v63 }
 0x615   :  { %v2115_v62 = vpop.f32.mrf.mxu1 }
 0x616   :  { %429 = vrot.lane.b32.xlu1 %v427_v61, %s2372_s18  ;;  %v1940_v4 = vmul.f32 -1.442695, %v420_v2  ;;  %v662_v2 = vld [vmem:[#allocation2 + $0xa] sm:$0x3] }
 0x618   :  { %2286 = vpow2.f32 %v1940_v4 }
 0x625   :  { %v2287_v6 = vpop.eup %2286 }
 0x626   :  { %v424_v7 = vadd.f32 1.0, %v2287_v6 }
 0x628   :  { %2288 = vrcp.f32 %v424_v7 }
 0x635   :  { %v2289_v8 = vpop.eup %2288 }
 0x636   :  { %v439_v16 = vsub.f32 1.0, %v2289_v8  ;;  %v445_v18 = vmul.f32 %v2289_v8, %v341_v58 }
 0x688   :  { %v430_v10 = vpop.permute.xlu1 %429 }
 0x689   :  { %v432_v11 = vmul.f32 %v2289_v8, %v430_v10 }
 0x68b   :  { %434 = vrot.lane.b32.xlu0 %v432_v11, %s2372_s18 }
 0x6fd   :  { %v435_v12 = vpop.permute.xlu0 %434 }
 0x6fe   :  { %v437_v13 = vadd.f32 %v435_v12, %v347_v63 }
 0x700   :  { %2290 = vtanh.f32 %v437_v13 }
 0x70d   :  { %v2291_v15 = vpop.eup %2290 }
 0x70e   :  { %441 = vrot.lane.b32.xlu1 %v2291_v15, %s2373_s25 }
 0x780   :  { %v442_v17 = vpop.permute.xlu1 %441 }
 0x781   :  { %v444_v19 = vmul.f32 %v442_v17, %v439_v16 }
 0x783   :  { %v446_v20 = vadd.f32 %v445_v18, %v444_v19 }
 0x785   :  { %448 = vrot.lane.b32.xlu0 %v446_v20, %s2373_s25 }
 0x7f7   :  { %v449_v21 = vpop.permute.xlu0 %448 }
 0x7f8   :  { %451 = vst.msk [vmem:[%s2847_s5 + $0x4] sm:$0x3] %vm240_vm3, %v449_v21  ;;  %2125 = vmatmul.mubr.msk.f32.vlgmr.msra.gmra.mxu0 %vm22_vm1, %v449_v21 }
 0x7f9   :  { %2139 = vmatpush3.msra.mxu0 %v2408_v1  ;;  %2146 = vmatprep.mubr.msk.f32.mxu0 %vm2371_vm0, %v2370_v0 }
 0x7fa   :  { %2140 = vmatprep.subr.mxu0 %v2370_v0 }
 0x7fb   :  { %2141 = vmatpush3.msra.mxu0 %v2416_v3 }
 0x7fc   :  { %2142 = vmatprep.subr.mxu0 %v2370_v0 }
 0x7fd   :  { %2143 = vmatpush3.msra.mxu0 %v2428_v5 }
 0x7fe   :  { %2144 = vmatprep.subr.mxu0 %v2370_v0 }
 0x7ff   :  { %2145 = vmatpush3.msra.mxu0 %v2448_v9 }
 0x800   :  { %2160 = vmatprep.subr.mxu0 %v2370_v0 }
 0x8b8   :  { %v521_v22 = vpop.f32.mrf.mxu0 }
 0x8b9   :  { %v532_v23 = vadd.f32 %v521_v22, %v2495_v14  ;;  %v525_v26 = vadd.f32 %v521_v22, %v452_v25 }
 0x8ba   :  { %v2126_v24 = vpop.f32.mrf.mxu0 }
 0x8bb   :  { %534 = vrot.lane.b32.xlu1 %v532_v23, %s2372_s18  ;;  %v1942_v27 = vmul.f32 -1.442695, %v525_v26  ;;  %v767_v24 = vld [vmem:[#allocation2 + $0xc] sm:$0x3] }
 0x8bd   :  { %2292 = vpow2.f32 %v1942_v27 }
 0x8ca   :  { %v2293_v28 = vpop.eup %2292 }
 0x8cb   :  { %v529_v29 = vadd.f32 1.0, %v2293_v28 }
 0x8cd   :  { %2294 = vrcp.f32 %v529_v29 }
 0x8da   :  { %v2295_v30 = vpop.eup %2294 }
 0x8db   :  { %v544_v36 = vsub.f32 1.0, %v2295_v30  ;;  %v550_v38 = vmul.f32 %v2295_v30, %v446_v20 }
 0x92d   :  { %v535_v31 = vpop.permute.xlu1 %534 }
 0x92e   :  { %v537_v32 = vmul.f32 %v2295_v30, %v535_v31 }
 0x930   :  { %539 = vrot.lane.b32.xlu0 %v537_v32, %s2372_s18 }
 0x9a2   :  { %v540_v33 = vpop.permute.xlu0 %539 }
 0x9a3   :  { %v542_v34 = vadd.f32 %v540_v33, %v452_v25 }
 0x9a5   :  { %2296 = vtanh.f32 %v542_v34 }
 0x9b2   :  { %v2297_v35 = vpop.eup %2296 }
 0x9b3   :  { %546 = vrot.lane.b32.xlu1 %v2297_v35, %s2373_s25 }
 0xa25   :  { %v547_v37 = vpop.permute.xlu1 %546 }
 0xa26   :  { %v549_v39 = vmul.f32 %v547_v37, %v544_v36 }
 0xa28   :  { %v551_v40 = vadd.f32 %v550_v38, %v549_v39 }
 0xa2a   :  { %553 = vrot.lane.b32.xlu0 %v551_v40, %s2373_s25 }
 0xa9c   :  { %v554_v41 = vpop.permute.xlu0 %553 }
 0xa9d   :  { %556 = vst.msk [vmem:[%s2847_s5 + $0x6] sm:$0x3] %vm240_vm3, %v554_v41  ;;  %2136 = vmatmul.mubr.msk.f32.vlgmr.msra.gmra.mxu1 %vm22_vm1, %v554_v41 }
 0xa9e   :  { %2150 = vmatpush3.msra.mxu1 %v2408_v1  ;;  %2157 = vmatprep.mubr.msk.f32.mxu1 %vm2371_vm0, %v2370_v0 }
 0xa9f   :  { %2151 = vmatprep.subr.mxu1 %v2370_v0 }
 0xaa0   :  { %2152 = vmatpush3.msra.mxu1 %v2416_v3 }
 0xaa1   :  { %2153 = vmatprep.subr.mxu1 %v2370_v0 }
 0xaa2   :  { %2154 = vmatpush3.msra.mxu1 %v2428_v5 }
 0xaa3   :  { %2155 = vmatprep.subr.mxu1 %v2370_v0 }
 0xaa4   :  { %2156 = vmatpush3.msra.mxu1 %v2448_v9  ;;  %v996_v20 = vld [vmem:[%s2847_s5] sm:$0xff] }
 0xb5d   :  { %v626_v42 = vpop.f32.mrf.mxu1 }
 0xb5e   :  { %v637_v43 = vadd.f32 %v626_v42, %v2495_v14  ;;  %v630_v46 = vadd.f32 %v626_v42, %v557_v45 }
 0xb5f   :  { %v2137_v44 = vpop.f32.mrf.mxu1 }
 0xb60   :  { %639 = vrot.lane.b32.xlu1 %v637_v43, %s2372_s18  ;;  %v1944_v47 = vmul.f32 -1.442695, %v630_v46  ;;  %v872_v44 = vld [vmem:[#allocation2 + $0xe] sm:$0x3] }
 0xb62   :  { %2298 = vpow2.f32 %v1944_v47 }
 0xb6f   :  { %v2299_v48 = vpop.eup %2298 }
 0xb70   :  { %v634_v49 = vadd.f32 1.0, %v2299_v48 }
 0xb72   :  { %2300 = vrcp.f32 %v634_v49 }
 0xb7f   :  { %v2301_v50 = vpop.eup %2300 }
 0xb80   :  { %v649_v56 = vsub.f32 1.0, %v2301_v50  ;;  %v655_v58 = vmul.f32 %v2301_v50, %v551_v40 }
 0xbd2   :  { %v640_v51 = vpop.permute.xlu1 %639 }
 0xbd3   :  { %v642_v52 = vmul.f32 %v2301_v50, %v640_v51 }
 0xbd5   :  { %644 = vrot.lane.b32.xlu0 %v642_v52, %s2372_s18 }
 0xc47   :  { %v645_v53 = vpop.permute.xlu0 %644 }
 0xc48   :  { %v647_v54 = vadd.f32 %v645_v53, %v557_v45 }
 0xc4a   :  { %2302 = vtanh.f32 %v647_v54  ;;  %v2641_v54 = vld [vmem:[%s2844_s2 + $0x30] sm:$0xff] }
 0xc57   :  { %v2303_v55 = vpop.eup %2302 }
 0xc58   :  { %651 = vrot.lane.b32.xlu1 %v2303_v55, %s2373_s25  ;;  %v2648_v55 = vld [vmem:[%s2844_s2 + $0x28] sm:$0xff] }
 0xcca   :  { %v652_v57 = vpop.permute.xlu1 %651 }
 0xccb   :  { %v654_v59 = vmul.f32 %v652_v57, %v649_v56  ;;  %v2655_v56 = vld [vmem:[%s2844_s2 + $0x20] sm:$0xff] }
 0xccd   :  { %v656_v60 = vadd.f32 %v655_v58, %v654_v59  ;;  %v1954_v58 = vld [vmem:[%s2845_s1 + $0x38] sm:$0xff]  ;;  %v1953_v59 = vld [vmem:[%s2845_s1 + $0x30] sm:$0xff] }
 0xcce   :  { %2171 = vmatprep.subr.mxu1 %v1954_v58 }
 0xccf   :  { %658 = vrot.lane.b32.xlu0 %v656_v60, %s2373_s25 }
 0xd41   :  { %v659_v61 = vpop.permute.xlu0 %658 }
 0xd42   :  { %661 = vst.msk [vmem:[%s2847_s5 + $0x8] sm:$0x3] %vm240_vm3, %v659_v61  ;;  %2147 = vmatmul.mubr.msk.f32.vlgmr.msra.gmra.mxu0 %vm22_vm1, %v659_v61  ;;  %v1951_v61 = vld [vmem:[%s2845_s1 + $0x20] sm:$0xff] }
 0xd43   :  { %2161 = vmatpush3.msra.mxu0 %v2408_v1  ;;  %2168 = vmatprep.mubr.msk.f32.mxu0 %vm2371_vm0, %v2370_v0 }
 0xd44   :  { %2162 = vmatprep.subr.mxu0 %v2370_v0 }
 0xd45   :  { %2163 = vmatpush3.msra.mxu0 %v2416_v3 }
 0xd46   :  { %2164 = vmatprep.subr.mxu0 %v2370_v0 }
 0xd47   :  { %2165 = vmatpush3.msra.mxu0 %v2428_v5 }
 0xd48   :  { %2166 = vmatprep.subr.mxu0 %v2370_v0 }
 0xd49   :  { %2167 = vmatpush3.msra.mxu0 %v2448_v9 }
 0xd4a   :  { %2182 = vmatprep.subr.mxu0 %v2370_v0 }
 0xe02   :  { %v731_v62 = vpop.f32.mrf.mxu0 }
 0xe03   :  { %v742_v1 = vadd.f32 %v731_v62, %v2495_v14  ;;  %v735_v4 = vadd.f32 %v731_v62, %v662_v2 }
 0xe04   :  { %v2148_v63 = vpop.f32.mrf.mxu0 }
 0xe05   :  { %744 = vrot.lane.b32.xlu1 %v742_v1, %s2372_s18  ;;  %v1946_v6 = vmul.f32 -1.442695, %v735_v4  ;;  %v1961_v63 = vld [vmem:[%s2848_s4 + $0x1] ss:$0 sm:$0xff] }
 0xe07   :  { %2304 = vpow2.f32 %v1946_v6 }
 0xe14   :  { %v2305_v3 = vpop.eup %2304 }
 0xe15   :  { %v739_v7 = vadd.f32 1.0, %v2305_v3 }
 0xe17   :  { %2306 = vrcp.f32 %v739_v7 }
 0xe24   :  { %v2307_v5 = vpop.eup %2306 }
 0xe25   :  { %v754_v13 = vsub.f32 1.0, %v2307_v5  ;;  %v760_v16 = vmul.f32 %v2307_v5, %v656_v60  ;;  %v1952_v60 = vld [vmem:[%s2845_s1 + $0x28] sm:$0xff] }
 0xe77   :  { %v745_v8 = vpop.permute.xlu1 %744 }
 0xe78   :  { %v747_v10 = vmul.f32 %v2307_v5, %v745_v8 }
 0xe7a   :  { %749 = vrot.lane.b32.xlu0 %v747_v10, %s2372_s18 }
 0xeec   :  { %v750_v9 = vpop.permute.xlu0 %749 }
 0xeed   :  { %v752_v11 = vadd.f32 %v750_v9, %v662_v2 }
 0xeef   :  { %2308 = vtanh.f32 %v752_v11  ;;  %v1962_v11 = vld [vmem:[%s2849_s3 + $0x1] ss:$0 sm:$0xff] }
 0xefc   :  { %v2309_v12 = vpop.eup %2308 }
 0xefd   :  { %756 = vrot.lane.b32.xlu1 %v2309_v12, %s2373_s25 }
 0xf6f   :  { %v757_v15 = vpop.permute.xlu1 %756 }
 0xf70   :  { %v759_v17 = vmul.f32 %v757_v15, %v754_v13 }
 0xf72   :  { %v761_v18 = vadd.f32 %v760_v16, %v759_v17 }
 0xf74   :  { %763 = vrot.lane.b32.xlu0 %v761_v18, %s2373_s25 }
 0xfe6   :  { %v764_v19 = vpop.permute.xlu0 %763 }
 0xfe7   :  { %766 = vst.msk [vmem:[%s2847_s5 + $0xa] sm:$0x3] %vm240_vm3, %v764_v19  ;;  %2158 = vmatmul.mubr.msk.f32.vlgmr.msra.gmra.mxu1 %vm22_vm1, %v764_v19 }
 0xfe8   :  { %2179 = vmatprep.mubr.msk.f32.mxu1 %vm22_vm1, %v996_v20  ;;  %2172 = vmatpush3.msra.mxu1 %v1954_v58 }
 0xfe9   :  { %2173 = vmatprep.subr.mxu1 %v1953_v59 }
 0xfea   :  { %2174 = vmatpush3.msra.mxu1 %v1953_v59 }
 0xfeb   :  { %2175 = vmatprep.subr.mxu1 %v1952_v60 }
 0xfec   :  { %2176 = vmatpush3.msra.mxu1 %v1952_v60 }
 0xfed   :  { %2177 = vmatprep.subr.mxu1 %v1951_v61 }
 0xfee   :  { %2178 = vmatpush3.msra.mxu1 %v1951_v61 }
 0xfef   :  { %2193 = vmatprep.subr.mxu1 %v2370_v0 }
0x10a7   :  { %v836_v21 = vpop.f32.mrf.mxu1 }
0x10a8   :  { %v847_v22 = vadd.f32 %v836_v21, %v2495_v14  ;;  %v840_v25 = vadd.f32 %v836_v21, %v767_v24 }
0x10a9   :  { %v2159_v23 = vpop.f32.mrf.mxu1 }
0x10aa   :  { %849 = vrot.lane.b32.xlu1 %v847_v22, %s2372_s18  ;;  %v1948_v26 = vmul.f32 -1.442695, %v840_v25 }
0x10ac   :  { %2310 = vpow2.f32 %v1948_v26 }
0x10b9   :  { %v2311_v27 = vpop.eup %2310 }
0x10ba   :  { %v844_v28 = vadd.f32 1.0, %v2311_v27 }
0x10bc   :  { %2312 = vrcp.f32 %v844_v28 }
0x10c9   :  { %v2313_v29 = vpop.eup %2312 }
0x10ca   :  { %v859_v35 = vsub.f32 1.0, %v2313_v29  ;;  %v865_v37 = vmul.f32 %v2313_v29, %v761_v18 }
0x111c   :  { %v850_v30 = vpop.permute.xlu1 %849 }
0x111d   :  { %v852_v31 = vmul.f32 %v2313_v29, %v850_v30 }
0x111f   :  { %854 = vrot.lane.b32.xlu0 %v852_v31, %s2372_s18 }
0x1191   :  { %v855_v32 = vpop.permute.xlu0 %854 }
0x1192   :  { %v857_v33 = vadd.f32 %v855_v32, %v767_v24 }
0x1194   :  { %2314 = vtanh.f32 %v857_v33 }
0x11a1   :  { %v2315_v34 = vpop.eup %2314 }
0x11a2   :  { %861 = vrot.lane.b32.xlu1 %v2315_v34, %s2373_s25 }
0x1214   :  { %v862_v36 = vpop.permute.xlu1 %861 }
0x1215   :  { %v864_v38 = vmul.f32 %v862_v36, %v859_v35 }
0x1217   :  { %v2619_v39 = vadd.f32 %v865_v37, %v864_v38 }
0x1219   :  { %868 = vrot.lane.b32.xlu0 %v2619_v39, %s2373_s25 }
0x128b   :  { %v869_v40 = vpop.permute.xlu0 %868 }
0x128c   :  { %871 = vst.msk [vmem:[%s2847_s5 + $0xc] sm:$0x3] %vm240_vm3, %v869_v40  ;;  %2169 = vmatmul.mubr.msk.f32.vlgmr.msra.gmra.mxu0 %vm22_vm1, %v869_v40 }
0x128d   :  { %2190 = vmatprep.mubr.msk.f32.mxu0 %vm2371_vm0, %v2370_v0 }
0x134c   :  { %v941_v41 = vpop.f32.mrf.mxu0 }
0x134d   :  { %v952_v42 = vadd.f32 %v941_v41, %v2495_v14  ;;  %v945_v45 = vadd.f32 %v941_v41, %v872_v44  ;;  %v2636_v14 = vld [vmem:[%s2844_s2 + $0x38] sm:$0xff] }
0x134e   :  { %v2170_v43 = vpop.f32.mrf.mxu0  ;;  %2183 = vmatpush3.msra.mxu0 %v2636_v14 }
0x134f   :  { %954 = vrot.lane.b32.xlu1 %v952_v42, %s2372_s18  ;;  %v1950_v46 = vmul.f32 -1.442695, %v945_v45  ;;  %2184 = vmatprep.subr.mxu0 %v2370_v0 }
0x1350   :  { %2185 = vmatpush3.msra.mxu0 %v2641_v54 }
0x1351   :  { %2316 = vpow2.f32 %v1950_v46  ;;  %2186 = vmatprep.subr.mxu0 %v2370_v0 }
0x1352   :  { %2187 = vmatpush3.msra.mxu0 %v2648_v55 }
0x1353   :  { %2188 = vmatprep.subr.mxu0 %v2370_v0 }
0x1354   :  { %2189 = vmatpush3.msra.mxu0 %v2655_v56 }
0x1355   :  { %2191 = vmatmul.mubr.f32.vlgmr.msra.gmra.mxu0 %v2370_v0  ;;  %2204 = vmatprep.subr.mxu0 %v2370_v0 }
0x1356   :  { %2205 = vmatpush3.msra.mxu0 %v2636_v14  ;;  %2212 = vmatprep.mubr.msk.f32.mxu0 %vm2371_vm0, %v2370_v0 }
0x1357   :  { %2206 = vmatprep.subr.mxu0 %v2370_v0 }
0x1358   :  { %2207 = vmatpush3.msra.mxu0 %v2641_v54 }
0x1359   :  { %2208 = vmatprep.subr.mxu0 %v2370_v0 }
0x135a   :  { %2209 = vmatpush3.msra.mxu0 %v2648_v55 }
0x135b   :  { %2210 = vmatprep.subr.mxu0 %v2370_v0 }
0x135c   :  { %2211 = vmatpush3.msra.mxu0 %v2655_v56 }
0x135d   :  { %2226 = vmatprep.subr.mxu0 %v2370_v0 }
0x135e   :  { %v2317_v47 = vpop.eup %2316 }
0x135f   :  { %v949_v48 = vadd.f32 1.0, %v2317_v47 }
0x1361   :  { %2318 = vrcp.f32 %v949_v48 }
0x136e   :  { %v2319_v49 = vpop.eup %2318 }
0x136f   :  { %v964_v62 = vsub.f32 1.0, %v2319_v49  ;;  %v970_v2 = vmul.f32 %v2319_v49, %v2619_v39 }
0x13c1   :  { %v955_v50 = vpop.permute.xlu1 %954 }
0x13c2   :  { %v957_v51 = vmul.f32 %v2319_v49, %v955_v50 }
0x13c4   :  { %959 = vrot.lane.b32.xlu0 %v957_v51, %s2372_s18 }
0x1415   :  { %v1154_v3 = vpop.f32.mrf.mxu0 }
0x1417   :  { %v2192_v7 = vpop.f32.mrf.mxu0 }
0x1436   :  { %v960_v52 = vpop.permute.xlu0 %959 }
0x1437   :  { %v962_v53 = vadd.f32 %v960_v52, %v872_v44 }
0x1439   :  { %2320 = vtanh.f32 %v962_v53 }
0x1446   :  { %v2321_v57 = vpop.eup %2320 }
0x1447   :  { %966 = vrot.lane.b32.xlu1 %v2321_v57, %s2373_s25 }
0x144b   :  { %1165 = vrot.lane.b32.xlu1 %v1961_v63, %s2372_s18 }
0x14b9   :  { %v967_v1 = vpop.permute.xlu1 %966 }
0x14ba   :  { %v969_v4 = vmul.f32 %v967_v1, %v964_v62 }
0x14bc   :  { %v971_v6 = vadd.f32 %v970_v2, %v969_v4 }
0x14bd   :  { %v2692_v5 = vpop.permute.xlu1 %1165 }
0x14be   :  { %973 = vrot.lane.b32.xlu0 %v971_v6, %s2373_s25  ;;  %v1168_v8 = vadd.f32 %v2692_v5, %v1154_v3 }
0x14c2   :  { %1170 = vrot.lane.b32.xlu0 %v1168_v8, %s2372_s18 }
0x1530   :  { %v974_v10 = vpop.permute.xlu0 %973 }
0x1531   :  { %976 = vst.msk [vmem:[%s2847_s5 + $0xe] sm:$0x3] %vm240_vm3, %v974_v10 }
0x1534   :  { %v1171_v22 = vpop.permute.xlu0 %1170 }
0x1538   :  { %v997_v9 = vld [vmem:[%s2847_s5 + $0x8] sm:$0xff] }
0x1539   :  { %2180 = vmatmul.mubr.msk.f32.vlgmr.msra.gmra.mxu1 %vm22_vm1, %v997_v9 }
0x153a   :  { %2194 = vmatpush3.msra.mxu1 %v2636_v14  ;;  %2201 = vmatprep.mubr.msk.f32.mxu1 %vm2371_vm0, %v2370_v0 }
0x153b   :  { %2195 = vmatprep.subr.mxu1 %v2370_v0 }
0x153c   :  { %2196 = vmatpush3.msra.mxu1 %v2641_v54 }
0x153d   :  { %2197 = vmatprep.subr.mxu1 %v2370_v0 }
0x153e   :  { %2198 = vmatpush3.msra.mxu1 %v2648_v55 }
0x153f   :  { %2199 = vmatprep.subr.mxu1 %v2370_v0 }
0x1540   :  { %2200 = vmatpush3.msra.mxu1 %v2655_v56 }
0x1541   :  { %2215 = vmatprep.subr.mxu1 %v2370_v0 }
0x15f9   :  { %v2181_v12 = vpop.f32.mrf.mxu1 }
0x15fa   :  { %v1082_v13 = vadd.f32 %v2181_v12, %v1962_v11 }
0x15fb   :  { %v1076_v15 = vpop.f32.mrf.mxu1 }
0x15fc   :  { %1086 = vst.msk [vmem:[#allocation2 + $0x8] sm:$0xff] %vm129_vm2, %v1082_v13  ;;  %v1077_v16 = vadd.f32 %v1962_v11, %v1076_v15 }
0x15fe   :  { %1085 = vst.msk [vmem:[#allocation2] sm:$0xff] %vm129_vm2, %v1077_v16 }
0x1605   :  { %v1087_v17 = vld [vmem:[#allocation2] sm:$0x3]  ;;  %v1193_v37 = vld [vmem:[#allocation2 + $0x2] sm:$0x3]  ;;  %v1298_v60 = vld [vmem:[#allocation2 + $0x4] sm:$0x3] }
0x1606   :  { %v1158_v18 = vadd.f32 %v1154_v3, %v1087_v17 }
0x1608   :  { %v1965_v19 = vmul.f32 -1.442695, %v1158_v18 }
0x160a   :  { %2322 = vpow2.f32 %v1965_v19  ;;  %v1403_v19 = vld [vmem:[#allocation2 + $0x6] sm:$0x3] }
0x1617   :  { %v2323_v20 = vpop.eup %2322 }
0x1618   :  { %v1162_v21 = vadd.f32 1.0, %v2323_v20 }
0x161a   :  { %2324 = vrcp.f32 %v1162_v21 }
0x1627   :  { %v2325_v23 = vpop.eup %2324 }
0x1628   :  { %v1173_v24 = vmul.f32 %v2325_v23, %v1171_v22  ;;  %v1180_v28 = vsub.f32 1.0, %v2325_v23  ;;  %v1186_v30 = vmul.f32 0.0, %v2325_v23 }
0x162a   :  { %1175 = vrot.lane.b32.xlu1 %v1173_v24, %s2372_s18 }
0x169c   :  { %v1176_v25 = vpop.permute.xlu1 %1175 }
0x169d   :  { %v1178_v26 = vadd.f32 %v1176_v25, %v1087_v17 }
0x169f   :  { %2326 = vtanh.f32 %v1178_v26 }
0x16ac   :  { %v2327_v27 = vpop.eup %2326 }
0x16ad   :  { %1182 = vrot.lane.b32.xlu0 %v2327_v27, %s2373_s25 }
0x171f   :  { %v1183_v29 = vpop.permute.xlu0 %1182 }
0x1720   :  { %v1185_v31 = vmul.f32 %v1183_v29, %v1180_v28 }
0x1722   :  { %v1187_v32 = vadd.f32 %v1186_v30, %v1185_v31 }
0x1724   :  { %1189 = vrot.lane.b32.xlu1 %v1187_v32, %s2373_s25 }
0x1796   :  { %v1190_v33 = vpop.permute.xlu1 %1189 }
0x1797   :  { %1192 = vst.msk [vmem:[%s2847_s5] sm:$0x3] %vm240_vm3, %v1190_v33  ;;  %2202 = vmatmul.mubr.msk.f32.vlgmr.msra.gmra.mxu1 %vm22_vm1, %v1190_v33 }
0x1798   :  { %2216 = vmatpush3.msra.mxu1 %v2636_v14  ;;  %2223 = vmatprep.mubr.msk.f32.mxu1 %vm2371_vm0, %v2370_v0 }
0x1799   :  { %2217 = vmatprep.subr.mxu1 %v2370_v0 }
0x179a   :  { %2218 = vmatpush3.msra.mxu1 %v2641_v54 }
0x179b   :  { %2219 = vmatprep.subr.mxu1 %v2370_v0 }
0x179c   :  { %2220 = vmatpush3.msra.mxu1 %v2648_v55 }
0x179d   :  { %2221 = vmatprep.subr.mxu1 %v2370_v0 }
0x179e   :  { %2222 = vmatpush3.msra.mxu1 %v2655_v56 }
0x179f   :  { %2237 = vmatprep.subr.mxu1 %v2370_v0 }
0x1857   :  { %v1262_v34 = vpop.f32.mrf.mxu1 }
0x1858   :  { %v1273_v35 = vadd.f32 %v1262_v34, %v2692_v5  ;;  %v1266_v38 = vadd.f32 %v1262_v34, %v1193_v37 }
0x1859   :  { %v2203_v36 = vpop.f32.mrf.mxu1 }
0x185a   :  { %1275 = vrot.lane.b32.xlu0 %v1273_v35, %s2372_s18  ;;  %v1967_v39 = vmul.f32 -1.442695, %v1266_v38 }
0x185c   :  { %2328 = vpow2.f32 %v1967_v39  ;;  %v1508_v39 = vld [vmem:[#allocation2 + $0x8] sm:$0x3] }
0x1869   :  { %v2329_v40 = vpop.eup %2328 }
0x186a   :  { %v1270_v41 = vadd.f32 1.0, %v2329_v40 }
0x186c   :  { %2330 = vrcp.f32 %v1270_v41 }
0x1879   :  { %v2331_v42 = vpop.eup %2330 }
0x187a   :  { %v1285_v48 = vsub.f32 1.0, %v2331_v42  ;;  %v1291_v50 = vmul.f32 %v2331_v42, %v1187_v32 }
0x18cc   :  { %v1276_v43 = vpop.permute.xlu0 %1275 }
0x18cd   :  { %v1278_v44 = vmul.f32 %v2331_v42, %v1276_v43 }
0x18cf   :  { %1280 = vrot.lane.b32.xlu1 %v1278_v44, %s2372_s18 }
0x1941   :  { %v1281_v45 = vpop.permute.xlu1 %1280 }
0x1942   :  { %v1283_v46 = vadd.f32 %v1281_v45, %v1193_v37 }
0x1944   :  { %2332 = vtanh.f32 %v1283_v46 }
0x1951   :  { %v2333_v47 = vpop.eup %2332 }
0x1952   :  { %1287 = vrot.lane.b32.xlu0 %v2333_v47, %s2373_s25 }
0x19c4   :  { %v1288_v49 = vpop.permute.xlu0 %1287 }
0x19c5   :  { %v1290_v51 = vmul.f32 %v1288_v49, %v1285_v48 }
0x19c7   :  { %v1292_v52 = vadd.f32 %v1291_v50, %v1290_v51 }
0x19c9   :  { %1294 = vrot.lane.b32.xlu1 %v1292_v52, %s2373_s25 }
0x1a3b   :  { %v1295_v53 = vpop.permute.xlu1 %1294 }
0x1a3c   :  { %1297 = vst.msk [vmem:[%s2847_s5 + $0x2] sm:$0x3] %vm240_vm3, %v1295_v53  ;;  %2213 = vmatmul.mubr.msk.f32.vlgmr.msra.gmra.mxu0 %vm22_vm1, %v1295_v53 }
0x1a3d   :  { %2227 = vmatpush3.msra.mxu0 %v2636_v14  ;;  %2234 = vmatprep.mubr.msk.f32.mxu0 %vm2371_vm0, %v2370_v0 }
0x1a3e   :  { %2228 = vmatprep.subr.mxu0 %v2370_v0 }
0x1a3f   :  { %2229 = vmatpush3.msra.mxu0 %v2641_v54 }
0x1a40   :  { %2230 = vmatprep.subr.mxu0 %v2370_v0 }
0x1a41   :  { %2231 = vmatpush3.msra.mxu0 %v2648_v55 }
0x1a42   :  { %2232 = vmatprep.subr.mxu0 %v2370_v0 }
0x1a43   :  { %2233 = vmatpush3.msra.mxu0 %v2655_v56 }
0x1a44   :  { %2248 = vmatprep.subr.mxu0 %v2370_v0 }
0x1afc   :  { %v1367_v57 = vpop.f32.mrf.mxu0 }
0x1afd   :  { %v1378_v58 = vadd.f32 %v1367_v57, %v2692_v5  ;;  %v1371_v61 = vadd.f32 %v1367_v57, %v1298_v60 }
0x1afe   :  { %v2214_v59 = vpop.f32.mrf.mxu0 }
0x1aff   :  { %1380 = vrot.lane.b32.xlu0 %v1378_v58, %s2372_s18  ;;  %v1969_v62 = vmul.f32 -1.442695, %v1371_v61 }
0x1b01   :  { %2334 = vpow2.f32 %v1969_v62 }
0x1b0e   :  { %v2335_v1 = vpop.eup %2334 }
0x1b0f   :  { %v1375_v63 = vadd.f32 1.0, %v2335_v1 }
0x1b11   :  { %2336 = vrcp.f32 %v1375_v63 }
0x1b1e   :  { %v2337_v2 = vpop.eup %2336 }
0x1b1f   :  { %v1390_v10 = vsub.f32 1.0, %v2337_v2  ;;  %v1396_v11 = vmul.f32 %v2337_v2, %v1292_v52 }
0x1b71   :  { %v1381_v4 = vpop.permute.xlu0 %1380 }
0x1b72   :  { %v1383_v6 = vmul.f32 %v2337_v2, %v1381_v4 }
0x1b74   :  { %1385 = vrot.lane.b32.xlu1 %v1383_v6, %s2372_s18 }
0x1be6   :  { %v1386_v3 = vpop.permute.xlu1 %1385 }
0x1be7   :  { %v1388_v7 = vadd.f32 %v1386_v3, %v1298_v60 }
0x1be9   :  { %2338 = vtanh.f32 %v1388_v7 }
0x1bf6   :  { %v2339_v8 = vpop.eup %2338 }
0x1bf7   :  { %1392 = vrot.lane.b32.xlu0 %v2339_v8, %s2373_s25 }
0x1c69   :  { %v1393_v9 = vpop.permute.xlu0 %1392 }
0x1c6a   :  { %v1395_v12 = vmul.f32 %v1393_v9, %v1390_v10 }
0x1c6c   :  { %v1397_v13 = vadd.f32 %v1396_v11, %v1395_v12 }
0x1c6e   :  { %1399 = vrot.lane.b32.xlu1 %v1397_v13, %s2373_s25 }
0x1ce0   :  { %v1400_v15 = vpop.permute.xlu1 %1399 }
0x1ce1   :  { %1402 = vst.msk [vmem:[%s2847_s5 + $0x4] sm:$0x3] %vm240_vm3, %v1400_v15  ;;  %2224 = vmatmul.mubr.msk.f32.vlgmr.msra.gmra.mxu1 %vm22_vm1, %v1400_v15 }
0x1ce2   :  { %2238 = vmatpush3.msra.mxu1 %v2636_v14  ;;  %2245 = vmatprep.mubr.msk.f32.mxu1 %vm2371_vm0, %v2370_v0 }
0x1ce3   :  { %2239 = vmatprep.subr.mxu1 %v2370_v0 }
0x1ce4   :  { %2240 = vmatpush3.msra.mxu1 %v2641_v54 }
0x1ce5   :  { %2241 = vmatprep.subr.mxu1 %v2370_v0 }
0x1ce6   :  { %2242 = vmatpush3.msra.mxu1 %v2648_v55 }
0x1ce7   :  { %2243 = vmatprep.subr.mxu1 %v2370_v0 }
0x1ce8   :  { %2244 = vmatpush3.msra.mxu1 %v2655_v56 }
0x1ce9   :  { %2259 = vmatprep.subr.mxu1 %v2370_v0 }
0x1da1   :  { %v1472_v16 = vpop.f32.mrf.mxu1 }
0x1da2   :  { %v1483_v17 = vadd.f32 %v1472_v16, %v2692_v5  ;;  %v1476_v20 = vadd.f32 %v1472_v16, %v1403_v19  ;;  %v1718_v16 = vld [vmem:[#allocation2 + $0xc] sm:$0x3] }
0x1da3   :  { %v2225_v18 = vpop.f32.mrf.mxu1 }
0x1da4   :  { %1485 = vrot.lane.b32.xlu0 %v1483_v17, %s2372_s18  ;;  %v1971_v21 = vmul.f32 -1.442695, %v1476_v20 }
0x1da6   :  { %2340 = vpow2.f32 %v1971_v21 }
0x1db3   :  { %v2341_v22 = vpop.eup %2340 }
0x1db4   :  { %v1480_v23 = vadd.f32 1.0, %v2341_v22 }
0x1db6   :  { %2342 = vrcp.f32 %v1480_v23 }
0x1dc3   :  { %v2343_v24 = vpop.eup %2342 }
0x1dc4   :  { %v1495_v30 = vsub.f32 1.0, %v2343_v24  ;;  %v1501_v32 = vmul.f32 %v2343_v24, %v1397_v13 }
0x1e16   :  { %v1486_v25 = vpop.permute.xlu0 %1485 }
0x1e17   :  { %v1488_v26 = vmul.f32 %v2343_v24, %v1486_v25 }
0x1e19   :  { %1490 = vrot.lane.b32.xlu1 %v1488_v26, %s2372_s18 }
0x1e8b   :  { %v1491_v27 = vpop.permute.xlu1 %1490 }
0x1e8c   :  { %v1493_v28 = vadd.f32 %v1491_v27, %v1403_v19 }
0x1e8e   :  { %2344 = vtanh.f32 %v1493_v28 }
0x1e9b   :  { %v2345_v29 = vpop.eup %2344 }
0x1e9c   :  { %1497 = vrot.lane.b32.xlu0 %v2345_v29, %s2373_s25 }
0x1f0e   :  { %v1498_v31 = vpop.permute.xlu0 %1497 }
0x1f0f   :  { %v1500_v33 = vmul.f32 %v1498_v31, %v1495_v30 }
0x1f11   :  { %v1502_v34 = vadd.f32 %v1501_v32, %v1500_v33 }
0x1f13   :  { %1504 = vrot.lane.b32.xlu1 %v1502_v34, %s2373_s25 }
0x1f85   :  { %v1505_v35 = vpop.permute.xlu1 %1504 }
0x1f86   :  { %1507 = vst.msk [vmem:[%s2847_s5 + $0x6] sm:$0x3] %vm240_vm3, %v1505_v35  ;;  %2235 = vmatmul.mubr.msk.f32.vlgmr.msra.gmra.mxu0 %vm22_vm1, %v1505_v35 }
0x1f87   :  { %2249 = vmatpush3.msra.mxu0 %v2636_v14  ;;  %2256 = vmatprep.mubr.msk.f32.mxu0 %vm2371_vm0, %v2370_v0 }
0x1f88   :  { %2250 = vmatprep.subr.mxu0 %v2370_v0 }
0x1f89   :  { %2251 = vmatpush3.msra.mxu0 %v2641_v54 }
0x1f8a   :  { %2252 = vmatprep.subr.mxu0 %v2370_v0 }
0x1f8b   :  { %2253 = vmatpush3.msra.mxu0 %v2648_v55 }
0x1f8c   :  { %2254 = vmatprep.subr.mxu0 %v2370_v0 }
0x1f8d   :  { %2255 = vmatpush3.msra.mxu0 %v2655_v56 }
0x2046   :  { %v1577_v36 = vpop.f32.mrf.mxu0 }
0x2047   :  { %v1588_v37 = vadd.f32 %v1577_v36, %v2692_v5  ;;  %v1581_v40 = vadd.f32 %v1577_v36, %v1508_v39  ;;  %v1823_v36 = vld [vmem:[#allocation2 + $0xe] sm:$0x3] }
0x2048   :  { %v2236_v38 = vpop.f32.mrf.mxu0 }
0x2049   :  { %1590 = vrot.lane.b32.xlu0 %v1588_v37, %s2372_s18  ;;  %v1973_v41 = vmul.f32 -1.442695, %v1581_v40 }
0x204b   :  { %2346 = vpow2.f32 %v1973_v41 }
0x2058   :  { %v2347_v42 = vpop.eup %2346 }
0x2059   :  { %v1585_v43 = vadd.f32 1.0, %v2347_v42 }
0x205b   :  { %2348 = vrcp.f32 %v1585_v43 }
0x2068   :  { %v2349_v44 = vpop.eup %2348 }
0x2069   :  { %v1600_v50 = vsub.f32 1.0, %v2349_v44  ;;  %v1606_v52 = vmul.f32 %v2349_v44, %v1502_v34 }
0x20bb   :  { %v1591_v45 = vpop.permute.xlu0 %1590 }
0x20bc   :  { %v1593_v46 = vmul.f32 %v2349_v44, %v1591_v45 }
0x20be   :  { %1595 = vrot.lane.b32.xlu1 %v1593_v46, %s2372_s18 }
0x2130   :  { %v1596_v47 = vpop.permute.xlu1 %1595 }
0x2131   :  { %v1598_v48 = vadd.f32 %v1596_v47, %v1508_v39 }
0x2133   :  { %2350 = vtanh.f32 %v1598_v48 }
0x2140   :  { %v2351_v49 = vpop.eup %2350 }
0x2141   :  { %1602 = vrot.lane.b32.xlu0 %v2351_v49, %s2373_s25 }
0x21b3   :  { %v1603_v51 = vpop.permute.xlu0 %1602 }
0x21b4   :  { %v1605_v53 = vmul.f32 %v1603_v51, %v1600_v50 }
0x21b6   :  { %v1607_v57 = vadd.f32 %v1606_v52, %v1605_v53 }
0x21b8   :  { %1609 = vrot.lane.b32.xlu1 %v1607_v57, %s2373_s25 }
0x222a   :  { %v1610_v58 = vpop.permute.xlu1 %1609 }
0x222b   :  { %1612 = vst.msk [vmem:[%s2847_s5 + $0x8] sm:$0x3] %vm240_vm3, %v1610_v58  ;;  %2246 = vmatmul.mubr.msk.f32.vlgmr.msra.gmra.mxu1 %vm22_vm1, %v1610_v58 }
0x222c   :  { %2260 = vmatpush3.msra.mxu1 %v2636_v14  ;;  %2267 = vmatprep.mubr.msk.f32.mxu1 %vm2371_vm0, %v2370_v0  ;;  %v1613_v14 = vld [vmem:[#allocation2 + $0xa] sm:$0x3] }
0x222d   :  { %2261 = vmatprep.subr.mxu1 %v2370_v0 }
0x222e   :  { %2262 = vmatpush3.msra.mxu1 %v2641_v54 }
0x222f   :  { %2263 = vmatprep.subr.mxu1 %v2370_v0 }
0x2230   :  { %2264 = vmatpush3.msra.mxu1 %v2648_v55 }
0x2231   :  { %2265 = vmatprep.subr.mxu1 %v2370_v0 }
0x2232   :  { %2266 = vmatpush3.msra.mxu1 %v2655_v56 }
0x22eb   :  { %v1682_v59 = vpop.f32.mrf.mxu1 }
0x22ec   :  { %v1693_v60 = vadd.f32 %v1682_v59, %v2692_v5  ;;  %v1686_v62 = vadd.f32 %v1682_v59, %v1613_v14 }
0x22ed   :  { %v2247_v61 = vpop.f32.mrf.mxu1 }
0x22ee   :  { %1695 = vrot.lane.b32.xlu0 %v1693_v60, %s2372_s18  ;;  %v1975_v1 = vmul.f32 -1.442695, %v1686_v62 }
0x22f0   :  { %2352 = vpow2.f32 %v1975_v1 }
0x22fd   :  { %v2353_v63 = vpop.eup %2352 }
0x22fe   :  { %v1690_v54 = vadd.f32 1.0, %v2353_v63 }
0x2300   :  { %2354 = vrcp.f32 %v1690_v54 }
0x230d   :  { %v2355_v2 = vpop.eup %2354 }
0x230e   :  { %v1705_v3 = vsub.f32 1.0, %v2355_v2  ;;  %v1711_v8 = vmul.f32 %v2355_v2, %v1607_v57 }
0x2360   :  { %v1696_v4 = vpop.permute.xlu0 %1695 }
0x2361   :  { %v1698_v55 = vmul.f32 %v2355_v2, %v1696_v4 }
0x2363   :  { %1700 = vrot.lane.b32.xlu1 %v1698_v55, %s2372_s18 }
0x23d5   :  { %v1701_v0 = vpop.permute.xlu1 %1700 }
0x23d6   :  { %v1703_v56 = vadd.f32 %v1701_v0, %v1613_v14 }
0x23d8   :  { %2356 = vtanh.f32 %v1703_v56 }
0x23e5   :  { %v2357_v6 = vpop.eup %2356 }
0x23e6   :  { %1707 = vrot.lane.b32.xlu0 %v2357_v6, %s2373_s25 }
0x2458   :  { %v1708_v7 = vpop.permute.xlu0 %1707 }
0x2459   :  { %v1710_v10 = vmul.f32 %v1708_v7, %v1705_v3 }
0x245b   :  { %v1712_v9 = vadd.f32 %v1711_v8, %v1710_v10 }
0x245d   :  { %1714 = vrot.lane.b32.xlu1 %v1712_v9, %s2373_s25 }
0x24cf   :  { %v1715_v11 = vpop.permute.xlu1 %1714 }
0x24d0   :  { %1717 = vst.msk [vmem:[%s2847_s5 + $0xa] sm:$0x3] %vm240_vm3, %v1715_v11  ;;  %2257 = vmatmul.mubr.msk.f32.vlgmr.msra.gmra.mxu0 %vm22_vm1, %v1715_v11 }
0x2590   :  { %v1787_v12 = vpop.f32.mrf.mxu0 }
0x2591   :  { %v1798_v13 = vadd.f32 %v1787_v12, %v2692_v5  ;;  %v1791_v17 = vadd.f32 %v1787_v12, %v1718_v16 }
0x2592   :  { %v2258_v15 = vpop.f32.mrf.mxu0 }
0x2593   :  { %1800 = vrot.lane.b32.xlu0 %v1798_v13, %s2372_s18  ;;  %v1977_v18 = vmul.f32 -1.442695, %v1791_v17 }
0x2595   :  { %2358 = vpow2.f32 %v1977_v18 }
0x25a2   :  { %v2359_v19 = vpop.eup %2358 }
0x25a3   :  { %v1795_v20 = vadd.f32 1.0, %v2359_v19 }
0x25a5   :  { %2360 = vrcp.f32 %v1795_v20 }
0x25b2   :  { %v2361_v21 = vpop.eup %2360 }
0x25b3   :  { %v1810_v27 = vsub.f32 1.0, %v2361_v21  ;;  %v1816_v29 = vmul.f32 %v2361_v21, %v1712_v9 }
0x2605   :  { %v1801_v22 = vpop.permute.xlu0 %1800 }
0x2606   :  { %v1803_v23 = vmul.f32 %v2361_v21, %v1801_v22 }
0x2608   :  { %1805 = vrot.lane.b32.xlu1 %v1803_v23, %s2372_s18 }
0x267a   :  { %v1806_v24 = vpop.permute.xlu1 %1805 }
0x267b   :  { %v1808_v25 = vadd.f32 %v1806_v24, %v1718_v16 }
0x267d   :  { %2362 = vtanh.f32 %v1808_v25 }
0x268a   :  { %v2363_v26 = vpop.eup %2362 }
0x268b   :  { %1812 = vrot.lane.b32.xlu0 %v2363_v26, %s2373_s25 }
0x26fd   :  { %v1813_v28 = vpop.permute.xlu0 %1812 }
0x26fe   :  { %v1815_v30 = vmul.f32 %v1813_v28, %v1810_v27 }
0x2700   :  { %v1817_v31 = vadd.f32 %v1816_v29, %v1815_v30 }
0x2702   :  { %1819 = vrot.lane.b32.xlu1 %v1817_v31, %s2373_s25 }
0x2774   :  { %v1820_v32 = vpop.permute.xlu1 %1819 }
0x2775   :  { %1822 = vst.msk [vmem:[%s2847_s5 + $0xc] sm:$0x3] %vm240_vm3, %v1820_v32  ;;  %2268 = vmatmul.mubr.msk.f32.vlgmr.msra.gmra.mxu1 %vm22_vm1, %v1820_v32 }
0x2835   :  { %v1892_v33 = vpop.f32.mrf.mxu1 }
0x2836   :  { %v1903_v34 = vadd.f32 %v1892_v33, %v2692_v5  ;;  %v1896_v37 = vadd.f32 %v1892_v33, %v1823_v36 }
0x2837   :  { %v2269_v35 = vpop.f32.mrf.mxu1 }
0x2838   :  { %1905 = vrot.lane.b32.xlu0 %v1903_v34, %s2372_s18  ;;  %v1979_v38 = vmul.f32 -1.442695, %v1896_v37 }
0x283a   :  { %2364 = vpow2.f32 %v1979_v38 }
0x2847   :  { %v2365_v39 = vpop.eup %2364 }
0x2848   :  { %v1900_v40 = vadd.f32 1.0, %v2365_v39 }
0x284a   :  { %2366 = vrcp.f32 %v1900_v40 }
0x2857   :  { %v2367_v41 = vpop.eup %2366 }
0x2858   :  { %v1915_v5 = vsub.f32 1.0, %v2367_v41  ;;  %v1921_v48 = vmul.f32 %v2367_v41, %v1817_v31 }
0x28aa   :  { %v1906_v42 = vpop.permute.xlu0 %1905 }
0x28ab   :  { %v1908_v43 = vmul.f32 %v2367_v41, %v1906_v42 }
0x28ad   :  { %1910 = vrot.lane.b32.xlu1 %v1908_v43, %s2372_s18 }
0x291f   :  { %v1911_v44 = vpop.permute.xlu1 %1910 }
0x2920   :  { %v1913_v45 = vadd.f32 %v1911_v44, %v1823_v36 }
0x2922   :  { %2368 = vtanh.f32 %v1913_v45 }
0x292f   :  { %v2369_v46 = vpop.eup %2368 }
0x2930   :  { %1917 = vrot.lane.b32.xlu0 %v2369_v46, %s2373_s25 }
0x29a2   :  { %v1918_v47 = vpop.permute.xlu0 %1917 }
0x29a3   :  { %v1920_v49 = vmul.f32 %v1918_v47, %v1915_v5 }
0x29a5   :  { %v1922_v50 = vadd.f32 %v1921_v48, %v1920_v49 }
0x29a7   :  { %1924 = vrot.lane.b32.xlu1 %v1922_v50, %s2373_s25 }
0x2a19   :  { %v1925_v51 = vpop.permute.xlu1 %1924 }
0x2a1a   :  { %1927 = vst.msk [vmem:[%s2847_s5 + $0xe] sm:$0x3] %vm240_vm3, %v1925_v51 }

</bundles_post_ra>
